<compile_context>
chip_gen: v7x
topology: tpu7x:2x2x1
jax: 0.10.0
libtpu: 0.0.40
codegen_flags: <defaults>
</compile_context>

<pallas_src>
import jax
import jax.numpy as jnp
from jax.experimental import pallas as pl
from jax.experimental.pallas import tpu as pltpu

D_IN = 2048       # fc1 in_features
D_H = 512         # fc1 out_features
NEG_SLOPE = 0.01  # F.leaky_relu default


def mine_kernel(xy_ref, w1_ref, b1_ref, w2_ref, o_ref, acc_ref):
    # grid = (output-column block j [parallel], contraction block k [arbitrary])
    k = pl.program_id(1)

    @pl.when(k == 0)
    def _():
        acc_ref[...] = jnp.zeros_like(acc_ref)

    # Fused fc1_x + fc1_y partial matmul (bf16 operands, f32 accumulation).
    acc_ref[...] += jnp.dot(xy_ref[...], w1_ref[...],
                            preferred_element_type=jnp.float32)

    @pl.when(k == pl.num_programs(1) - 1)
    def _():
        h = acc_ref[...] + b1_ref[...]                           # fused bias
        h = jnp.where(h >= 0, h, NEG_SLOPE * h)                  # leaky_relu
        # fc2 partial over this column block: lane reduce on the VPU/XLU
        # instead of a wasteful N=1 MXU matmul + lane-sparse store.
        part = jnp.sum(h * w2_ref[...], axis=-1, keepdims=True)  # (B, 1)
        o_ref[...] = part[None].astype(o_ref.dtype)              # (1, B, 1)


def mine_forward(x, y, params, *, tk=2048, tn=256):
    """h2 = fc2(leaky_relu(fc1_x(x) + fc1_y(y)))  ->  (B, 1) float32."""
    w1x, b1x, w1y, b1y, w2, b2 = params
    B0 = x.shape[0]

    # Pad batch to a multiple of 8 (sublane alignment).
    B = max(8, ((B0 + 7) // 8) * 8)
    if B != B0:
        x = jnp.pad(x, ((0, B - B0), (0, 0)))
        y = jnp.pad(y, ((0, B - B0), (0, 0)))

    K = 2 * D_IN
    assert K % tk == 0 and D_H % tn == 0
    nk, ncol = K // tk, D_H // tn

    # Argument prep. For static weights the caller would do this fusion/cast
    # once and reuse the fused bf16 weight across calls to amortize it.
    xy = jnp.concatenate([x, y], axis=1).astype(jnp.bfloat16)       # (B, 2*D_IN)
    w1 = jnp.concatenate([w1x, w1y], axis=0).astype(jnp.bfloat16)   # (2*D_IN, D_H)
    b1 = (b1x + b1y).astype(jnp.float32).reshape(1, D_H)            # (1, D_H)
    w2_row = w2.reshape(1, D_H).astype(jnp.float32)                 # (1, D_H)

    partials = pl.pallas_call(
        mine_kernel,
        out_shape=jax.ShapeDtypeStruct((ncol, B, 1), jnp.float32),
        grid=(ncol, nk),
        in_specs=[
            pl.BlockSpec((B, tk), lambda j, k: (0, k)),    # xy  (activations)
            pl.BlockSpec((tk, tn), lambda j, k: (k, j)),   # W1  (fused weights)
            pl.BlockSpec((1, tn), lambda j, k: (0, j)),    # b1  (fused bias)
            pl.BlockSpec((1, tn), lambda j, k: (0, j)),    # w2^T row vector
        ],
        out_specs=pl.BlockSpec((1, B, 1), lambda j, k: (j, 0, 0)),
        scratch_shapes=[pltpu.VMEM((B, tn), jnp.float32)],
        compiler_params=pltpu.CompilerParams(
            dimension_semantics=("parallel", "arbitrary"),
            vmem_limit_bytes=32 << 20),
    )(xy, w1, b1, w2_row)

    # Sum the per-column-block partials of the fc2 reduction and add its bias.
    out = partials.sum(axis=0) + b2.reshape(1, 1)
    return out[:B0]


def init_params(key):
    k1, k2, k3, k4, k5, k6 = jax.random.split(key, 6)
    # Deterministic synthetic init (uniform, scaled like PyTorch's default bound).
    def lin(kw, kb, fan_in, fan_out):
        bound = 1.0 / jnp.sqrt(fan_in)
        w = jax.random.uniform(kw, (fan_in, fan_out), jnp.float32, -bound, bound)
        b = jax.random.uniform(kb, (1, fan_out), jnp.float32, -bound, bound)
        return w, b
    w1x, b1x = lin(k1, k2, D_IN, D_H)
    w1y, b1y = lin(k3, k4, D_IN, D_H)
    w2, b2 = lin(k5, k6, D_H, 1)
    return (w1x, b1x, w1y, b1y, w2, b2)


def mine_ref_f32(x, y, params):
    # Full-precision PyTorch-equivalent forward.
    w1x, b1x, w1y, b1y, w2, b2 = params
    h = x @ w1x + b1x + y @ w1y + b1y
    h = jnp.where(h >= 0, h, NEG_SLOPE * h)
    return h @ w2 + b2


def mine_ref_bf16(x, y, params):
    # Same bf16 operand rounding as the kernel (f32 accumulation).
    w1x, b1x, w1y, b1y, w2, b2 = params
    h = (jnp.dot(x.astype(jnp.bfloat16), w1x.astype(jnp.bfloat16),
                 preferred_element_type=jnp.float32)
         + jnp.dot(y.astype(jnp.bfloat16), w1y.astype(jnp.bfloat16),
                   preferred_element_type=jnp.float32)
         + b1x + b1y)
    h = jnp.where(h >= 0, h, NEG_SLOPE * h)
    return h @ w2 + b2


if __name__ == "__main__":
    key = jax.random.PRNGKey(0)
    kx, ky, kp = jax.random.split(key, 3)
    B = 8
    x = jax.random.normal(kx, (B, D_IN), jnp.float32)
    y = jax.random.normal(ky, (B, D_IN), jnp.float32)
    params = init_params(kp)

    out = mine_forward(x, y, params)
    jax.block_until_ready(out)
    assert out.shape == (B, 1)

    # Tight check against a reference with matching bf16 operand rounding.
    ref16 = mine_ref_bf16(x, y, params)
    assert jnp.allclose(out, ref16, atol=2e-3, rtol=2e-3), "bf16 ref mismatch"

    # Loose check against the full-f32 module semantics (bf16 weight rounding
    # introduces ~1e-3 absolute error on this output scale).
    ref32 = mine_ref_f32(x, y, params)
    assert jnp.allclose(out, ref32, atol=5e-2, rtol=5e-2), "f32 ref mismatch"

    print("KERNEL_OK")
</pallas_src>

<mosaic_0001>
module attributes {stable_mosaic.version = 11 : i64} {
  func.func @mine_kernel(%arg0: i32, %arg1: i32, %arg2: memref<8x2048xbf16, #tpu.memory_space<vmem>>, %arg3: memref<2048x256xbf16, #tpu.memory_space<vmem>>, %arg4: memref<1x256xf32, #tpu.memory_space<vmem>>, %arg5: memref<1x256xf32, #tpu.memory_space<vmem>>, %arg6: memref<1x8x1xf32, #tpu.memory_space<vmem>>, %arg7: memref<8x256xf32, #tpu.memory_space<vmem>>) attributes {dimension_semantics = [#tpu.dimension_semantics<parallel>, #tpu.dimension_semantics<arbitrary>], iteration_bounds = array<i64: 2, 2>, scalar_prefetch = 0 : i64, scratch_operands = 1 : i64, tpu.core_type = #tpu.core_type<tc>, window_params = [{transform_indices = @transform_0, window_bounds = array<i64: 8, 2048>}, {transform_indices = @transform_1, window_bounds = array<i64: 2048, 256>}, {transform_indices = @transform_2, window_bounds = array<i64: 1, 256>}, {transform_indices = @transform_3, window_bounds = array<i64: 1, 256>}, {transform_indices = @transform_4, window_bounds = array<i64: 1, 8, 1>}]} {
    %c0_i32 = arith.constant 0 : i32
    %0 = arith.cmpi eq, %arg1, %c0_i32 : i32
    %1 = arith.extui %0 : i1 to i32
    %c0_i32_0 = arith.constant 0 : i32
    %2 = arith.cmpi ne, %1, %c0_i32_0 : i32
    scf.if %2 {
      %cst_9 = arith.constant 0.000000e+00 : f32
      %12 = vector.broadcast %cst_9 : f32 to vector<8x256xf32>
      %c0_10 = arith.constant 0 : index
      %c0_11 = arith.constant 0 : index
      %13 = vector.load %arg7[%c0_10, %c0_11] : memref<8x256xf32, #tpu.memory_space<vmem>>, vector<8x256xf32>
      tpu.vector_store %arg7[%c0_10, %c0_11], %12 {strides = array<i32>} : memref<8x256xf32, #tpu.memory_space<vmem>>, vector<8x256xf32>,
    } else {
    }
    %c0 = arith.constant 0 : index
    %c0_1 = arith.constant 0 : index
    %3 = vector.load %arg7[%c0, %c0_1] : memref<8x256xf32, #tpu.memory_space<vmem>>, vector<8x256xf32>
    %c0_2 = arith.constant 0 : index
    %c0_3 = arith.constant 0 : index
    %4 = vector.load %arg2[%c0_2, %c0_3] : memref<8x2048xbf16, #tpu.memory_space<vmem>>, vector<8x2048xbf16>
    %c0_4 = arith.constant 0 : index
    %c0_5 = arith.constant 0 : index
    %5 = vector.load %arg3[%c0_4, %c0_5] : memref<2048x256xbf16, #tpu.memory_space<vmem>>, vector<2048x256xbf16>
    %cst = arith.constant dense<0.000000e+00> : vector<8x256xf32>
    %6 = tpu.matmul %4, %5, %cst {dimension_numbers = #tpu.dot_dimension_numbers<[1], [0], [0], [1], [0, 0, 1, 1], [], []>} : vector<8x2048xbf16>, vector<2048x256xbf16>, vector<8x256xf32> -> vector<8x256xf32>
    %7 = arith.addf %3, %6 : vector<8x256xf32>
    %c0_6 = arith.constant 0 : index
    %c0_7 = arith.constant 0 : index
    %8 = vector.load %arg7[%c0_6, %c0_7] : memref<8x256xf32, #tpu.memory_space<vmem>>, vector<8x256xf32>
    tpu.vector_store %arg7[%c0_6, %c0_7], %7 {strides = array<i32>} : memref<8x256xf32, #tpu.memory_space<vmem>>, vector<8x256xf32>,
    %c1_i32 = arith.constant 1 : i32
    %9 = arith.cmpi eq, %arg1, %c1_i32 : i32
    %10 = arith.extui %9 : i1 to i32
    %c0_i32_8 = arith.constant 0 : i32
    %11 = arith.cmpi ne, %10, %c0_i32_8 : i32
    scf.if %11 {
      %c0_9 = arith.constant 0 : index
      %c0_10 = arith.constant 0 : index
      %12 = vector.load %arg7[%c0_9, %c0_10] : memref<8x256xf32, #tpu.memory_space<vmem>>, vector<8x256xf32>
      %c0_11 = arith.constant 0 : index
      %c0_12 = arith.constant 0 : index
      %13 = vector.load %arg4[%c0_11, %c0_12] : memref<1x256xf32, #tpu.memory_space<vmem>>, vector<1x256xf32>
      %14 = vector.broadcast %13 : vector<1x256xf32> to vector<8x256xf32>
      %15 = arith.addf %12, %14 : vector<8x256xf32>
      %cst_13 = arith.constant 0.000000e+00 : f32
      %16 = vector.broadcast %cst_13 : f32 to vector<8x256xf32>
      %17 = arith.cmpf oge, %15, %16 : vector<8x256xf32>
      %cst_14 = arith.constant 0.00999999977 : f32
      %18 = vector.broadcast %cst_14 : f32 to vector<8x256xf32>
      %19 = arith.mulf %18, %15 : vector<8x256xf32>
      %20 = arith.select %17, %15, %19 : vector<8x256xi1>, vector<8x256xf32>
      %c0_15 = arith.constant 0 : index
      %c0_16 = arith.constant 0 : index
      %21 = vector.load %arg5[%c0_15, %c0_16] : memref<1x256xf32, #tpu.memory_space<vmem>>, vector<1x256xf32>
      %22 = vector.broadcast %21 : vector<1x256xf32> to vector<8x256xf32>
      %23 = arith.mulf %20, %22 : vector<8x256xf32>
      %cst_17 = arith.constant dense<0.000000e+00> : vector<8xf32>
      %24 = vector.multi_reduction <add>, %23, %cst_17 [1] : vector<8x256xf32> to vector<8xf32>
      %25 = vector.shape_cast %24 : vector<8xf32> to vector<8x1xf32>
      %26 = vector.shape_cast %25 : vector<8x1xf32> to vector<1x8x1xf32>
      %c0_18 = arith.constant 0 : index
      %c0_19 = arith.constant 0 : index
      %c0_20 = arith.constant 0 : index
      %27 = vector.load %arg6[%c0_18, %c0_19, %c0_20] : memref<1x8x1xf32, #tpu.memory_space<vmem>>, vector<1x8x1xf32>
      tpu.vector_store %arg6[%c0_18, %c0_19, %c0_20], %26 {strides = array<i32>} : memref<1x8x1xf32, #tpu.memory_space<vmem>>, vector<1x8x1xf32>,
    } else {
    }
    return
  }
  func.func @transform_0(%arg0: i32, %arg1: i32) -> (i32, i32) {
    %c0_i32 = arith.constant 0 : i32
    %c0_i32_0 = arith.constant 0 : i32
    return %c0_i32, %arg1 : i32, i32
  }
  func.func @transform_1(%arg0: i32, %arg1: i32) -> (i32, i32) {
    %c0_i32 = arith.constant 0 : i32
    return %arg1, %arg0 : i32, i32
  }
  func.func @transform_2(%arg0: i32, %arg1: i32) -> (i32, i32) {
    %c0_i32 = arith.constant 0 : i32
    %c0_i32_0 = arith.constant 0 : i32
    return %c0_i32, %arg0 : i32, i32
  }
  func.func @transform_3(%arg0: i32, %arg1: i32) -> (i32, i32) {
    %c0_i32 = arith.constant 0 : i32
    %c0_i32_0 = arith.constant 0 : i32
    return %c0_i32, %arg0 : i32, i32
  }
  func.func @transform_4(%arg0: i32, %arg1: i32) -> (i32, i32, i32) {
    %c0_i32 = arith.constant 0 : i32
    %c0_i32_0 = arith.constant 0 : i32
    %c0_i32_1 = arith.constant 0 : i32
    return %arg0, %c0_i32, %c0_i32_0 : i32, i32, i32
  }
}

</mosaic_0001>

<bundles_post_ra>
// kernel: tpu_custom_call.1
= control target key start
LH: loop header
LB: loop body
LE: loop exit
PB: predicated region body
PF: predicated region fallthrough
CT: control target
= control target key end

     0   :  { %s4315_s0 = inlined_call_operand.hbm [shape: bf16[8,4096], index: 0, kind: input, shape index: {}]   ;;  %s4316_s1 = inlined_call_operand.hbm [shape: bf16[4096,512], index: 1, kind: input, shape index: {}]   ;;  %s4317_s2 = inlined_call_operand.hbm [shape: f32[1,512], index: 2, kind: input, shape index: {}]   ;;  %s4318_s3 = inlined_call_operand.hbm [shape: f32[1,512], index: 3, kind: input, shape index: {}]   ;;  %s4319_s4 = inlined_call_operand.vmem [shape: f32[2,8,1], index: 4, kind: output, shape index: {}]  }
   0x1   :  { %4334 = sst [smem:[#allocation19_spill]] %s4315_s0 }
   0x2   :  { %4335 = sst [smem:[#allocation20_spill]] %s4316_s1 }
   0x3   :  { %4336 = sst [smem:[#allocation21_spill]] %s4317_s2 }
   0x4   :  { %4337 = sst [smem:[#allocation22_spill]] %s4318_s3 }
   0x5   :  { %4338 = sst [smem:[#allocation23_spill]] %s4319_s4 }
   0x6   :  { %9 = vsyncpa [#allocation4], 0 }
   0x7   :  { %11 = vsyncpa [#allocation4 + $0x1], 0 }
   0x8   :  { %12 = vsyncpa [#allocation6], 0 }
   0x9   :  { %14 = vsyncpa [#allocation6 + $0x1], 0 }
   0xa   :  { %15 = vsyncpa [#allocation9], 0 }
   0xb   :  { %17 = vsyncpa [#allocation9 + $0x1], 0  ;;  %s3602_s15 = smov 0   ;;  %s3604_s16 = smov 0  }
   0xc   :  { %s3606_s17 = smov 0   ;;  %s3608_s18 = smov 0  }
   0xd   :  { %s3610_s19 = smov 0   ;;  %s3612_s20 = smov 0  }
   0xe   :  { %s3614_s21 = smov 0   ;;  %s3616_s22 = smov 0  }
   0xf   :  { %s3618_s23 = smov 0   ;;  %s3620_s24 = smov 0  }
  0x10   :  { %s3622_s25 = smov 0   ;;  %s3624_s26 = smov 0  }
  0x11   :  { %s3626_s27 = smov 0   ;;  %s3628_s28 = smov 0  }
  0x12 LB: > { %4339 = sst [smem:[#allocation14_spill]] %s3515_s15  ;;  %s32_s29 = sadd.s32 1, %s3559_s26  ;;  %s3567_s28 = sphi %s3628_s28, %s23_s28   ;;  %s3563_s27 = sphi %s3626_s27, %s4388_s27   ;;  %s3559_s26 = sphi %s3624_s26, %s4387_s26   ;;  %s3555_s25 = sphi %s3622_s25, %s4386_s25   ;;  %s3551_s24 = sphi %s3620_s24, %s4385_s24   ;;  %s3547_s23 = sphi %s3618_s23, %s4384_s23   ;;  %s3543_s22 = sphi %s3616_s22, %s4383_s22   ;;  %s3539_s21 = sphi %s3614_s21, %s4382_s21   ;;  %s3535_s20 = sphi %s3612_s20, %s4381_s20   ;;  %s3531_s19 = sphi %s3610_s19, %s4380_s19   ;;  %s3527_s18 = sphi %s3608_s18, %s4379_s18   ;;  %s3523_s17 = sphi %s3606_s17, %s4378_s17   ;;  %s3519_s16 = sphi %s3604_s16, %s4377_s16   ;;  %s3515_s15 = sphi %s3602_s15, %s4376_s15  }
  0x13   : > { %4340 = sst [smem:[#allocation15_spill]] %s3551_s24  ;;  %s35_s30 = sadd.s32 1, %s3563_s27 }
  0x14   : > { %4341 = sst [smem:[#allocation16_spill]] %s3555_s25  ;;  %p33_p0 = scmp.ge.s32.totalorder %s32_s29, 2 }
  0x15   : > { %p4327_p1 = scmp.eq.s32.totalorder %s3567_s28, 0  ;;  %s70_s5 = sadd.s32 1, %s3535_s20 }
  0x16   : > { %p77_p2 = scmp.ne.s32.totalorder %s3535_s20, %s3531_s19  ;;  %s4390_s29 = smov (%p33_p0, %s32_s29), 0 }
  0x17   : > { %4342 = sst [smem:[#allocation17_spill]] %s4390_s29  ;;  %s4392_s30 = smov (!%p33_p0, %s35_s30), %s3563_s27 }
  0x18   : > { %s3683_s6 = ssub.s32 %s3559_s26, %s4390_s29  ;;  %p3687_p3 = por %p77_p2, %p4327_p1 }
  0x19   : > { %p37_p4 = scmp.ge.s32.totalorder %s4392_s30, 2  ;;  %p4325_p6 = scmp.lt.s32.totalorder %s3567_s28, 4 }
  0x1a   : > { %s2779_s8 = sshll.u32 %s3559_s26, 10  ;;  %s204_s9 = sand.u32 1, %s3567_s28  }
  0x1b   : > { %s4394_s30 = smov (%p37_p4, %s4392_s30), 0  ;;  %s206_s12 = sand.u32 1, %s3535_s20  }
  0x1c   : > { %4344 = sst [smem:[#allocation18_spill]] %s4394_s30  ;;  %s3700_s10 = ssub.s32 %s3563_s27, %s4394_s30 }
  0x1d   : > { %s67_s11 = sor.u32 %s3700_s10, %s3683_s6  ;;  %s2486_s13 = sshll.u32 %s206_s12, 11 }
  0x1e   : > { %p68_p7 = scmp.eq.s32.totalorder %s67_s11, 0  ;;  %s2488_s14 = sshll.u32 %s3563_s27, 1 }
  0x1f   : > { %s215_s24 = sadd.s32 %s2779_s8, %s2488_s14  ;;  %s208_s4 = scalar_lea.vmem [#allocation5], %s2486_s13 }
  0x20   : > { %s3707_s29 = scalar_select %p68_p7, %s3535_s20, %s70_s5  }
  0x21   : > { %s218_s25 = sshll.u32 %s208_s4, 4  ;;  %s2490_s3 = sshll.u32 %s215_s24, 6  ;;  %s3711_s25 = int_to_ptr.vmem [resolvable:$true] %s218_s25 }
  0x22   : > { %s4345_s1 = sld [smem:[#allocation20_spill]]  ;;  %p3722_p8 = pnand %p4325_p6, %p3687_p3 }
  0x23   : > { %s3726_s4 = scalar_lea.sflag [#allocation6], %s204_s9 }
  0x24   : > { %p3323_p10 = pneg %p3722_p8 }
  0x28   : > { %s3716_s30 = scalar_lea.hbm %s4345_s1, %s2490_s3  ;;  %s3326_s15 = scalar_lea.hbm %s4345_s1, 131072 }
  0x29   : > { %s3321_s24 = scalar_lea.hbm %s3716_s30, 32768  ;;  %p3327_p13 = scmp.lt.u32.totalorder %s3716_s30, %s4345_s1 }
  0x2a   : > { %p3322_p9 = scmp.ne.s32.totalorder %s3716_s30, %s3321_s24  ;;  %p3328_p0 = scmp.lt.u32.totalorder %s3326_s15, %s3321_s24 }
  0x2b   : > { %p3330_p3 = scmp.lt.u32.totalorder %s3321_s24, %s3716_s30 }
  0x2c   : > { %p3324_p11 = pnand %p3323_p10, %p3322_p9  ;;  %p3329_p2 = por %p3328_p0, %p3327_p13 }
  0x2e   : > { %p3325_p12 = pneg %p3324_p11  ;;  %p3331_p4 = por %p3330_p3, %p3329_p2 }
  0x30   : > { %p3332_p7 = pnand %p3331_p4, %p3325_p12 }
  0x32   : > { %3335 = shalt.err (!%p3332_p7)
}
  0x33   : > { %s3336_s9 = scalar_lea.vmem %s3711_s25, 32768  ;;  %s3569_s12 = smov [#allocation5]  }
  0x34   : > { %p3337_p9 = scmp.ne.s32.totalorder %s3711_s25, %s3336_s9  ;;  %s3341_s13 = sshll.u32 %s3569_s12, 4  ;;  %s3342_s13 = int_to_ptr.vmem [resolvable:$false] %s3341_s13 }
  0x35   : > { %s3343_s14 = scalar_lea.vmem %s3342_s13, 65536  ;;  %p3344_p5 = scmp.lt.s32.totalorder %s3711_s25, %s3342_s13 }
  0x36   : > { %p3339_p11 = pnand %p3337_p9, %p3323_p10  ;;  %p3345_p13 = scmp.lt.s32.totalorder %s3343_s14, %s3336_s9 }
  0x38   : > { %p3340_p6 = pneg %p3339_p11  ;;  %p3346_p0 = por %p3345_p13, %p3344_p5 }
  0x3a   : > { %p3347_p2 = pnand %p3346_p0, %p3340_p6 }
  0x3c   : > { %3350 = shalt.err (!%p3347_p2)
}
  0x3d   : > { %s3570_s24 = smov 256   ;;  %s3571_s2 = smov 128  }
  0x3e   : > { %s3572_s3 = smov 8   ;;  %p2497_p5 = scmp.ge.s32.totalorder %s3567_s28, 1 }
  0x3f   : > { %2797 = dma.hbm_to_vmem [thread:$0]  (!%p3722_p8), %s3716_s30, 32768, %s3711_s25, %s3726_s4, %s3570_s24, %s3571_s2, %s3572_s3  }
  0x40   : > { %p264_p6 = scmp.lt.s32.totalorder %s3567_s28, 5  ;;  %s4326_s7 = sadd.s32 4294967295, %s3567_s28  }
  0x41   : > { %p40_p12 = scmp.eq.s32.totalorder %s3683_s6, 0  ;;  %s42_s11 = sadd.s32 1, %s3547_s23 }
  0x42   : > { %p3756_p10 = pnand %p2497_p5, %p264_p6  ;;  %p49_p3 = scmp.ne.s32.totalorder %s3547_s23, %s3543_s22 }
  0x43   : > { %p55_p4 = scmp.ne.s32.totalorder %s3543_s22, %s3539_s21  ;;  %p3774_p9 = scmp.eq.s32.totalorder %s4326_s7, 0 }
  0x44   : > { %s4347_s15 = scalar_select %p3756_p10, 1, 0 }
  0x45   : > { %s3768_s9 = scalar_select %p40_p12, %s3547_s23, %s42_s11  }
  0x46   : > { %p51_p7 = por %p4327_p1, %p49_p3  ;;  %s185_s25 = sand.u32 1, %s3547_s23  }
  0x47   : > { %s4349_s0 = sld [smem:[#allocation19_spill]]  ;;  %p3788_p8 = por %p3774_p9, %p55_p4 }
  0x48   : > { %p4351_p11 = scmp.ne.s32.totalorder %s3531_s19, %s3527_s18  ;;  %s2483_s14 = sshll.u32 %s185_s25, 6 }
  0x49   : > { %s4350_s21 = scalar_select %p3788_p8, 1, 0 }
  0x4a   : > { %p3797_p13 = por %p4351_p11, %p3774_p9  ;;  %p4353_p0 = scmp.lt.s32.totalorder %s3567_s28, 4 }
  0x4b   : > { %s189_s24 = scalar_lea.vmem [#allocation3], %s2483_s14  ;;  %s186_s3 = scalar_lea.sflag [#allocation4], %s185_s25 }
  0x4c   : > { %s4352_s13 = scalar_select %p3797_p13, 1, 0 }
  0x4d   : > { %s3784_s6 = scalar_lea.hbm %s4349_s0, %s2779_s8  ;;  %p3803_p2 = pnand %p4353_p0, %p51_p7 }
  0x4e   : > { %s197_s2 = sshll.u32 %s189_s24, 4  ;;  %s3351_s11 = scalar_lea.hbm %s3784_s6, 1024  ;;  %s3807_s2 = int_to_ptr.vmem [resolvable:$true] %s197_s2 }
  0x4f   : > { %p3352_p5 = scmp.ne.s32.totalorder %s3784_s6, %s3351_s11  ;;  %p3353_p6 = pneg %p3803_p2 }
  0x50   : > { %s3356_s12 = scalar_lea.hbm %s4349_s0, 2048  ;;  %p3357_p4 = scmp.lt.u32.totalorder %s3784_s6, %s4349_s0 }
  0x51   : > { %p3354_p12 = pnand %p3353_p6, %p3352_p5  ;;  %p3358_p7 = scmp.lt.u32.totalorder %s3356_s12, %s3351_s11 }
  0x52   : > { %p3360_p0 = scmp.lt.u32.totalorder %s3351_s11, %s3784_s6 }
  0x53   : > { %p3355_p3 = pneg %p3354_p12  ;;  %p3359_p11 = por %p3358_p7, %p3357_p4 }
  0x55   : > { %p3361_p1 = por %p3360_p0, %p3359_p11 }
  0x57   : > { %p3362_p13 = pnand %p3361_p1, %p3355_p3 }
  0x59   : > { %3365 = shalt.err (!%p3362_p13)
}
  0x5a   : > { %s3366_s25 = scalar_lea.vmem %s3807_s2, 1024  ;;  %s3573_s14 = smov [#allocation3]  }
  0x5b   : > { %p3367_p5 = scmp.ne.s32.totalorder %s3807_s2, %s3366_s25  ;;  %s3371_s24 = sshll.u32 %s3573_s14, 4  ;;  %s3372_s24 = int_to_ptr.vmem [resolvable:$false] %s3371_s24 }
  0x5c   : > { %s3373_s1 = scalar_lea.vmem %s3372_s24, 2048  ;;  %p3374_p10 = scmp.lt.s32.totalorder %s3807_s2, %s3372_s24 }
  0x5d   : > { %p3369_p12 = pnand %p3367_p5, %p3353_p6  ;;  %p3375_p4 = scmp.lt.s32.totalorder %s3373_s1, %s3366_s25 }
  0x5f   : > { %p3370_p8 = pneg %p3369_p12  ;;  %p3376_p7 = por %p3375_p4, %p3374_p10 }
  0x61   : > { %p3377_p11 = pnand %p3376_p7, %p3370_p8 }
  0x63   : > { %3380 = shalt.err (!%p3377_p11)
}
  0x64   : > { %s4355_s7 = sld [smem:[#allocation14_spill]]  ;;  %p94_p1 = scmp.eq.s32.totalorder %s3700_s10, 0 }
  0x65   : > { %2794 = dma.hbm_to_vmem [thread:$0]  (!%p3803_p2), %s3784_s6, 1024, %s3807_s2, %s186_s3  }
  0x66   : > { %s96_s11 = sadd.s32 1, %s3523_s17  ;;  %p103_p10 = scmp.ne.s32.totalorder %s3523_s17, %s3519_s16 }
  0x67   : > { %s3839_s8 = scalar_select %p94_p1, %s3523_s17, %s96_s11  }
  0x68   : > { %p4356_p8 = scmp.eq.s32.totalorder %s3567_s28, 0  ;;  %s4330_s18 = sand.u32 1, %s3523_s17  }
  0x69   : > { %s4331_s30 = sshll.u32 %s3563_s27, 5  ;;  %s3855_s25 = sshll.u32 %s4330_s18, 1 }
  0x6a   : > { %p105_p13 = por %p103_p10, %p4356_p8  ;;  %p109_p6 = scmp.ne.s32.totalorder %s3519_s16, %s4355_s7 }
  0x6b   : > { %s4358_s2 = sld [smem:[#allocation21_spill]]  ;;  %s232_s14 = scalar_lea.vmem [#allocation7], %s3855_s25 }
  0x6c   : > { %p3849_p3 = por %p109_p6, %p3774_p9  ;;  %s240_s5 = sshll.u32 %s232_s14, 4  ;;  %s241_s5 = int_to_ptr.vmem [resolvable:$true] %s240_s5 }
  0x6d   : > { %p4359_p9 = scmp.lt.s32.totalorder %s3567_s28, 4 }
  0x6e   : > { %s4357_s12 = scalar_select %p3849_p3, 1, 0 }
  0x6f   : > { %p3867_p2 = pnand %p4359_p9, %p105_p13 }
  0x71   : > { %s3862_s3 = scalar_lea.hbm %s4358_s2, %s4331_s30  ;;  %p3383_p5 = pneg %p3867_p2 }
  0x72   : > { %s3381_s1 = scalar_lea.hbm %s3862_s3, 32  ;;  %s3386_s6 = scalar_lea.hbm %s4358_s2, 64 }
  0x73   : > { %p3382_p0 = scmp.ne.s32.totalorder %s3862_s3, %s3381_s1  ;;  %p3387_p7 = scmp.lt.u32.totalorder %s3862_s3, %s4358_s2 }
  0x74   : > { %p3388_p11 = scmp.lt.u32.totalorder %s3386_s6, %s3381_s1  ;;  %p3390_p10 = scmp.lt.u32.totalorder %s3381_s1, %s3862_s3 }
  0x75   : > { %p3384_p12 = pnand %p3383_p5, %p3382_p0 }
  0x76   : > { %p3389_p1 = por %p3388_p11, %p3387_p7 }
  0x77   : > { %p3385_p4 = pneg %p3384_p12 }
  0x78   : > { %p3391_p8 = por %p3390_p10, %p3389_p1 }
  0x7a   : > { %p3392_p13 = pnand %p3391_p8, %p3385_p4 }
  0x7c   : > { %3395 = shalt.err (!%p3392_p13)
}
  0x7d   : > { %s3396_s18 = scalar_lea.vmem %s241_s5, 32  ;;  %s3574_s30 = smov [#allocation7]  }
  0x7e   : > { %p3397_p6 = scmp.ne.s32.totalorder %s241_s5, %s3396_s18  ;;  %s3401_s7 = sshll.u32 %s3574_s30, 4  ;;  %s3402_s7 = int_to_ptr.vmem [resolvable:$false] %s3401_s7 }
  0x7f   : > { %s3403_s11 = scalar_lea.vmem %s3402_s7, 64  ;;  %p3404_p12 = scmp.lt.s32.totalorder %s241_s5, %s3402_s7 }
  0x80   : > { %p3399_p9 = pnand %p3397_p6, %p3383_p5  ;;  %p3405_p3 = scmp.lt.s32.totalorder %s3403_s11, %s3396_s18 }
  0x82   : > { %p3400_p0 = pneg %p3399_p9  ;;  %p3406_p7 = por %p3405_p3, %p3404_p12 }
  0x84   : > { %p3407_p11 = pnand %p3406_p7, %p3400_p0 }
  0x86   : > { %3410 = shalt.err (!%p3407_p11)
}
  0x87   : > { %2800 = dma.hbm_to_vmem [thread:$0]  (!%p3867_p2), %s3862_s3, 32, %s241_s5, %s3726_s4  }
  0x88   : > { %s4361_s1 = sshll.u32 %s3563_s27, 5  ;;  %s4362_s30 = sld [smem:[#allocation22_spill]] }
  0x89   : > { %s251_s18 = scalar_lea.vmem [#allocation8], %s3855_s25  ;;  %s4363_s11 = sand.u32 1, %s3523_s17  }
  0x8a   : > { %s259_s7 = sshll.u32 %s251_s18, 4  ;;  %s248_s0 = scalar_lea.sflag [#allocation9], %s4363_s11  ;;  %s260_s7 = int_to_ptr.vmem [resolvable:$true] %s259_s7 }
  0x8e   : > { %s3898_s14 = scalar_lea.hbm %s4362_s30, %s4361_s1  ;;  %s3416_s5 = scalar_lea.hbm %s4362_s30, 64 }
  0x8f   : > { %s3411_s2 = scalar_lea.hbm %s3898_s14, 32  ;;  %p3417_p10 = scmp.lt.u32.totalorder %s3898_s14, %s4362_s30 }
  0x90   : > { %p3412_p3 = scmp.ne.s32.totalorder %s3898_s14, %s3411_s2  ;;  %p3418_p8 = scmp.lt.u32.totalorder %s3416_s5, %s3411_s2 }
  0x91   : > { %p3420_p6 = scmp.lt.u32.totalorder %s3411_s2, %s3898_s14 }
  0x92   : > { %p3414_p4 = pnand %p3412_p3, %p3383_p5  ;;  %p3419_p13 = por %p3418_p8, %p3417_p10 }
  0x94   : > { %p3415_p1 = pneg %p3414_p4  ;;  %p3421_p9 = por %p3420_p6, %p3419_p13 }
  0x96   : > { %p3422_p0 = pnand %p3421_p9, %p3415_p1 }
  0x98   : > { %3425 = shalt.err (!%p3422_p0)
}
  0x99   : > { %s3426_s25 = scalar_lea.vmem %s260_s7, 32  ;;  %s3575_s10 = smov [#allocation8]  }
  0x9a   : > { %p3427_p12 = scmp.ne.s32.totalorder %s260_s7, %s3426_s25  ;;  %s3431_s18 = sshll.u32 %s3575_s10, 4  ;;  %s3432_s18 = int_to_ptr.vmem [resolvable:$false] %s3431_s18 }
  0x9b   : > { %s3433_s11 = scalar_lea.vmem %s3432_s18, 64  ;;  %p3434_p3 = scmp.lt.s32.totalorder %s260_s7, %s3432_s18 }
  0x9c   : > { %p3429_p7 = pnand %p3427_p12, %p3383_p5  ;;  %p3435_p4 = scmp.lt.s32.totalorder %s3433_s11, %s3426_s25 }
  0x9e   : > { %p3430_p11 = pneg %p3429_p7  ;;  %p3436_p8 = por %p3435_p4, %p3434_p3 }
  0xa0   : > { %p3437_p10 = pnand %p3436_p8, %p3430_p11 }
  0xa2   : > { %3440 = shalt.err (!%p3437_p10)
}
  0xa3   : > { %2803 = dma.hbm_to_vmem [thread:$0]  (!%p3867_p2), %s3898_s14, 32, %s260_s7, %s248_s0  }
  0xa4   : > { %p4364_p1 = scmp.ne.s32.totalorder %s4347_s15, 0 }
  0xa5   : > { %s270_s2 = sand.u32 (!%p4364_p1), 1, %s3543_s22   ;;  %p4365_p5 = scmp.ne.s32.totalorder (!%p4364_p1), %s4350_s21, 0 }
  0xa6   : > { %268 = sbr.rel (%p4364_p1) target bundleno = 838 (0x346), region = 36  ;;  %s2498_s4 = sshll.u32 (!%p4364_p1), %s270_s2, 6 }
  0xa7   : > { %s271_s3 = scalar_lea.sflag (!%p4364_p1), [#allocation4], %s270_s2  ;;  %s3925_s5 = scalar_lea.vmem (!%p4364_p1), [#allocation3], %s2498_s4 }
  0xad   : > { %3498 = dma.done.wait (%p4365_p5), %s271_s3, 1024  }
  0xae   : > { %3500 = vsyncadd (%p4365_p5), %s271_s3, 4294966272  ;;  %s4366_s1 = sadd.s32 4294967295, %s3567_s28   ;;  %s281_s24 = sand.u32 1, %s3531_s19  }
  0xaf   : > { %s279_s0 = sand.u32 1, %s4366_s1   ;;  %s2499_s15 = sshll.u32 %s281_s24, 11 }
  0xb0   : > { %s280_s14 = scalar_lea.sflag [#allocation6], %s279_s0  ;;  %s3934_s7 = scalar_lea.vmem [#allocation5], %s2499_s15 }
  0xb1   : > { %p4367_p2 = scmp.ne.s32.totalorder %s4352_s13, 0 }
  0xb3   : > { %3502 = dma.done.wait (%p4367_p2), %s280_s14, 32768  }
  0xb4   : > { %3504 = vsyncadd (%p4367_p2), %s280_s14, 4294934528  ;;  %s290_s6 = sand.u32 1, %s3519_s16   ;;  %p4368_p13 = scmp.ne.s32.totalorder %s4357_s12, 0 }
  0xb5   : > { %s3941_s21 = sshll.u32 %s290_s6, 1 }
  0xb6   : > { %s292_s25 = scalar_lea.vmem [#allocation7], %s3941_s21 }
  0xb7   : > { %3506 = dma.done.wait (%p4368_p13), %s280_s14, 32  }
  0xb8   : > { %3508 = vsyncadd (%p4368_p13), %s280_s14, 4294967264  ;;  %s298_s10 = scalar_lea.sflag [#allocation9], %s290_s6  ;;  %s301_s18 = scalar_lea.vmem [#allocation8], %s3941_s21 }
  0xb9   : > { %3510 = dma.done.wait (%p4368_p13), %s298_s10, 32  }
  0xba   : > { %3512 = vsyncadd (%p4368_p13), %s298_s10, 4294967264  ;;  %s4369_s13 = sld [smem:[#allocation16_spill]]  ;;  %s4370_s3 = sld [smem:[#allocation23_spill]] }
  0xbb   : > { %s4371_s0 = sld [smem:[#allocation15_spill]] }
  0xc0   : > { %p345_p6 = scmp.lt.s32.totalorder %s4369_s13, 1 }
  0xc1   : > { %p2503_p9 = scmp.ne.s32.totalorder %s4371_s0, 0 }
  0xc2   : > { %s4396_s13 = smov (!%p345_p6, %s4369_s13), 1  ;;  %v3576_v0 = vmov (!%p2503_p9), 0.0  }
  0xc3   : > { %s2502_s11 = sshll.u32 %s4396_s13, 3  ;;  %352 = sbr.rel (%p2503_p9) target bundleno = 202 (0xca), region = 56  ;;  %353 = vst [vmem:[#allocation2] sm:$0xff] (!%p2503_p9), %v3576_v0  ;;  %354 = vst [vmem:[#allocation2 + $0x8] sm:$0xff] (!%p2503_p9), %v3576_v0 }
  0xc4   : > { %s3958_s1 = scalar_lea.vmem %s4370_s3, %s2502_s11 }
  0xca PF: > { %v2921_v1 = vld [vmem:[%s3934_s7 + $0x4] ss:$8 sps:$4 sm:$0xff]   ;;  %v2925_v3 = vld [vmem:[%s3934_s7] ss:$8 sps:$4 sm:$0xff]   ;;  %v2927_v5 = vld [vmem:[%s3934_s7 + $0x14] ss:$8 sps:$4 sm:$0xff]  }
  0xcb   : > { %v2923_v2 = vld [vmem:[%s3934_s7 + $0x104] ss:$8 sps:$4 sm:$0xff]   ;;  %1957 = vmatprep.subr.bf16.mxu0 %v2921_v1  ;;  %v2926_v4 = vld [vmem:[%s3934_s7 + $0x100] ss:$8 sps:$4 sm:$0xff]   ;;  %v2929_v6 = vld [vmem:[%s3934_s7 + $0x114] ss:$8 sps:$4 sm:$0xff]  }
  0xcc   : > { %1998 = vmatprep.subr.bf16.mxu1 %v2923_v2  ;;  %1958 = vmatpush1.bf16.msra.mxu0 %v2925_v3  ;;  %v2931_v7 = vld [vmem:[%s3934_s7 + $0x10] ss:$8 sps:$4 sm:$0xff]   ;;  %v2933_v9 = vld [vmem:[%s3934_s7 + $0x24] ss:$8 sps:$4 sm:$0xff]   ;;  %v2937_v11 = vld [vmem:[%s3934_s7 + $0x20] ss:$8 sps:$4 sm:$0xff]  }
  0xcd   : > { %1999 = vmatpush1.bf16.msra.mxu1 %v2926_v4  ;;  %1959 = vmatprep.subr.bf16.mxu0 %v2927_v5  ;;  %v2932_v8 = vld [vmem:[%s3934_s7 + $0x110] ss:$8 sps:$4 sm:$0xff]   ;;  %v2935_v10 = vld [vmem:[%s3934_s7 + $0x124] ss:$8 sps:$4 sm:$0xff]   ;;  %v2938_v12 = vld [vmem:[%s3934_s7 + $0x120] ss:$8 sps:$4 sm:$0xff]  }
  0xce   : > { %2000 = vmatprep.subr.bf16.mxu1 %v2929_v6  ;;  %v2939_v13 = vld [vmem:[%s3934_s7 + $0x34] ss:$8 sps:$4 sm:$0xff]   ;;  %v2943_v15 = vld [vmem:[%s3934_s7 + $0x30] ss:$8 sps:$4 sm:$0xff]   ;;  %v2945_v17 = vld [vmem:[%s3934_s7 + $0x44] ss:$8 sps:$4 sm:$0xff]  }
  0xcf   : > { %v2941_v14 = vld [vmem:[%s3934_s7 + $0x134] ss:$8 sps:$4 sm:$0xff]   ;;  %v2944_v16 = vld [vmem:[%s3934_s7 + $0x130] ss:$8 sps:$4 sm:$0xff]   ;;  %v2947_v18 = vld [vmem:[%s3934_s7 + $0x144] ss:$8 sps:$4 sm:$0xff]  }
  0xd0   : > { %1960 = vmatpush1.bf16.msra.mxu0 %v2931_v7  ;;  %v2949_v19 = vld [vmem:[%s3934_s7 + $0x40] ss:$8 sps:$4 sm:$0xff]   ;;  %v2951_v21 = vld [vmem:[%s3934_s7 + $0x54] ss:$8 sps:$4 sm:$0xff]   ;;  %v2955_v23 = vld [vmem:[%s3934_s7 + $0x50] ss:$8 sps:$4 sm:$0xff]  }
  0xd1   : > { %2001 = vmatpush1.bf16.msra.mxu1 %v2932_v8  ;;  %1961 = vmatprep.subr.bf16.mxu0 %v2933_v9  ;;  %v2950_v20 = vld [vmem:[%s3934_s7 + $0x140] ss:$8 sps:$4 sm:$0xff]   ;;  %v2953_v22 = vld [vmem:[%s3934_s7 + $0x154] ss:$8 sps:$4 sm:$0xff]   ;;  %v2956_v24 = vld [vmem:[%s3934_s7 + $0x150] ss:$8 sps:$4 sm:$0xff]  }
  0xd2   : > { %2002 = vmatprep.subr.bf16.mxu1 %v2935_v10  ;;  %v2957_v25 = vld [vmem:[%s3934_s7 + $0x64] ss:$8 sps:$4 sm:$0xff]   ;;  %v2961_v27 = vld [vmem:[%s3934_s7 + $0x60] ss:$8 sps:$4 sm:$0xff]   ;;  %v2963_v29 = vld [vmem:[%s3934_s7 + $0x74] ss:$8 sps:$4 sm:$0xff]  }
  0xd3   : > { %v2959_v26 = vld [vmem:[%s3934_s7 + $0x164] ss:$8 sps:$4 sm:$0xff]   ;;  %v2962_v28 = vld [vmem:[%s3934_s7 + $0x160] ss:$8 sps:$4 sm:$0xff]   ;;  %v2965_v30 = vld [vmem:[%s3934_s7 + $0x174] ss:$8 sps:$4 sm:$0xff]  }
  0xd4   : > { %1962 = vmatpush1.bf16.msra.mxu0 %v2937_v11  ;;  %v2967_v31 = vld [vmem:[%s3934_s7 + $0x70] ss:$8 sps:$4 sm:$0xff]   ;;  %v2969_v33 = vld [vmem:[%s3934_s7 + $0x84] ss:$8 sps:$4 sm:$0xff]   ;;  %v2973_v35 = vld [vmem:[%s3934_s7 + $0x80] ss:$8 sps:$4 sm:$0xff]  }
  0xd5   : > { %2003 = vmatpush1.bf16.msra.mxu1 %v2938_v12  ;;  %1963 = vmatprep.subr.bf16.mxu0 %v2939_v13  ;;  %v2968_v32 = vld [vmem:[%s3934_s7 + $0x170] ss:$8 sps:$4 sm:$0xff]   ;;  %v2971_v34 = vld [vmem:[%s3934_s7 + $0x184] ss:$8 sps:$4 sm:$0xff]   ;;  %v2974_v36 = vld [vmem:[%s3934_s7 + $0x180] ss:$8 sps:$4 sm:$0xff]  }
  0xd6   : > { %2004 = vmatprep.subr.bf16.mxu1 %v2941_v14  ;;  %v2975_v37 = vld [vmem:[%s3934_s7 + $0x94] ss:$8 sps:$4 sm:$0xff]   ;;  %v2979_v39 = vld [vmem:[%s3934_s7 + $0x90] ss:$8 sps:$4 sm:$0xff]   ;;  %v2981_v41 = vld [vmem:[%s3934_s7 + $0xa4] ss:$8 sps:$4 sm:$0xff]  }
  0xd7   : > { %v2977_v38 = vld [vmem:[%s3934_s7 + $0x194] ss:$8 sps:$4 sm:$0xff]   ;;  %v2980_v40 = vld [vmem:[%s3934_s7 + $0x190] ss:$8 sps:$4 sm:$0xff]   ;;  %v2983_v42 = vld [vmem:[%s3934_s7 + $0x1a4] ss:$8 sps:$4 sm:$0xff]  }
  0xd8   : > { %1964 = vmatpush1.bf16.msra.mxu0 %v2943_v15  ;;  %v2985_v43 = vld [vmem:[%s3934_s7 + $0xa0] ss:$8 sps:$4 sm:$0xff]   ;;  %v2987_v45 = vld [vmem:[%s3934_s7 + $0xb4] ss:$8 sps:$4 sm:$0xff]   ;;  %v2991_v50 = vld [vmem:[%s3934_s7 + $0xb0] ss:$8 sps:$4 sm:$0xff]  }
  0xd9   : > { %2005 = vmatpush1.bf16.msra.mxu1 %v2944_v16  ;;  %1965 = vmatprep.subr.bf16.mxu0 %v2945_v17  ;;  %v2986_v44 = vld [vmem:[%s3934_s7 + $0x1a0] ss:$8 sps:$4 sm:$0xff]   ;;  %v2989_v46 = vld [vmem:[%s3934_s7 + $0x1b4] ss:$8 sps:$4 sm:$0xff]   ;;  %v2992_v51 = vld [vmem:[%s3934_s7 + $0x1b0] ss:$8 sps:$4 sm:$0xff]  }
  0xda   : > { %2006 = vmatprep.subr.bf16.mxu1 %v2947_v18  ;;  %v357_v47 = vld [vmem:[%s3925_s5] sm:$0xff]  ;;  %v358_v49 = vld [vmem:[%s3925_s5 + $0x8] sm:$0xff]  ;;  %v2999_v57 = vld [vmem:[%s3934_s7 + $0xd4] ss:$8 sps:$4 sm:$0xff]   ;;  %s4372_s12 = sld [smem:[#allocation15_spill]] }
  0xdb   : > { %v2505_v48 = vcombine.high %v357_v47, %v357_v47  ;;  %v2507_v52 = vcombine.high %v358_v49, %v358_v49  ;;  %v2993_v53 = vld [vmem:[%s3934_s7 + $0xc4] ss:$8 sps:$4 sm:$0xff]   ;;  %v2997_v55 = vld [vmem:[%s3934_s7 + $0xc0] ss:$8 sps:$4 sm:$0xff]   ;;  %v3001_v58 = vld [vmem:[%s3934_s7 + $0x1d4] ss:$8 sps:$4 sm:$0xff]   ;;  %v2504_v7 = vcombine.low %v357_v47, %v357_v47  ;;  %v2506_v8 = vcombine.low %v358_v49, %v358_v49 }
  0xdc   : > { %1966 = vmatpush1.bf16.msra.mxu0 %v2949_v19  ;;  %v2995_v54 = vld [vmem:[%s3934_s7 + $0x1c4] ss:$8 sps:$4 sm:$0xff]   ;;  %v2998_v56 = vld [vmem:[%s3934_s7 + $0x1c0] ss:$8 sps:$4 sm:$0xff]   ;;  %v3003_v59 = vld [vmem:[%s3934_s7 + $0xd0] ss:$8 sps:$4 sm:$0xff]  }
  0xdd   : > { %2007 = vmatpush1.bf16.msra.mxu1 %v2950_v20  ;;  %1967 = vmatprep.subr.bf16.mxu0 %v2951_v21  ;;  %v3004_v60 = vld [vmem:[%s3934_s7 + $0x1d0] ss:$8 sps:$4 sm:$0xff]   ;;  %v3005_v61 = vld [vmem:[%s3934_s7 + $0xe4] ss:$8 sps:$4 sm:$0xff]   ;;  %v3009_v63 = vld [vmem:[%s3934_s7 + $0xe0] ss:$8 sps:$4 sm:$0xff]  }
  0xde   : > { %2008 = vmatprep.subr.bf16.mxu1 %v2953_v22  ;;  %1989 = vmatprep.mubr.bf16.mxu0 %v2505_v48  ;;  %v3007_v62 = vld [vmem:[%s3934_s7 + $0x1e4] ss:$8 sps:$4 sm:$0xff]   ;;  %v3010_v0 = vld [vmem:[%s3934_s7 + $0x1e0] ss:$8 sps:$4 sm:$0xff]   ;;  %v3011_v1 = vld [vmem:[%s3934_s7 + $0xf4] ss:$8 sps:$4 sm:$0xff]  }
  0xdf   : > { %2030 = vmatprep.mubr.bf16.mxu1 %v2507_v52  ;;  %v3013_v2 = vld [vmem:[%s3934_s7 + $0x1f4] ss:$8 sps:$4 sm:$0xff]   ;;  %v3015_v3 = vld [vmem:[%s3934_s7 + $0xf0] ss:$8 sps:$4 sm:$0xff]   ;;  %v3023_v5 = vld [vmem:[%s3934_s7 + $0x204] ss:$8 sps:$4 sm:$0xff]  }
  0xe0   : > { %1968 = vmatpush1.bf16.msra.mxu0 %v2955_v23  ;;  %v3016_v4 = vld [vmem:[%s3934_s7 + $0x1f0] ss:$8 sps:$4 sm:$0xff]   ;;  %v3026_v6 = vld [vmem:[%s3934_s7 + $0x304] ss:$8 sps:$4 sm:$0xff]   ;;  %v3021_v9 = vld [vmem:[%s3934_s7 + $0x200] ss:$8 sps:$4 sm:$0xff]  }
  0xe1   : > { %2009 = vmatpush1.bf16.msra.mxu1 %v2956_v24  ;;  %1969 = vmatprep.subr.bf16.mxu0 %v2957_v25  ;;  %v3024_v10 = vld [vmem:[%s3934_s7 + $0x300] ss:$8 sps:$4 sm:$0xff]   ;;  %v3029_v11 = vld [vmem:[%s3934_s7 + $0x214] ss:$8 sps:$4 sm:$0xff]   ;;  %v3027_v13 = vld [vmem:[%s3934_s7 + $0x210] ss:$8 sps:$4 sm:$0xff]  }
  0xe2   : > { %2010 = vmatprep.subr.bf16.mxu1 %v2959_v26  ;;  %v3032_v12 = vld [vmem:[%s3934_s7 + $0x314] ss:$8 sps:$4 sm:$0xff]   ;;  %v3030_v14 = vld [vmem:[%s3934_s7 + $0x310] ss:$8 sps:$4 sm:$0xff]   ;;  %v3035_v15 = vld [vmem:[%s3934_s7 + $0x224] ss:$8 sps:$4 sm:$0xff]  }
  0xe3   : > { %v3038_v16 = vld [vmem:[%s3934_s7 + $0x324] ss:$8 sps:$4 sm:$0xff]   ;;  %v3033_v17 = vld [vmem:[%s3934_s7 + $0x220] ss:$8 sps:$4 sm:$0xff]   ;;  %v3041_v19 = vld [vmem:[%s3934_s7 + $0x234] ss:$8 sps:$4 sm:$0xff]  }
  0xe4   : > { %1970 = vmatpush1.bf16.msra.mxu0 %v2961_v27  ;;  %v3036_v18 = vld [vmem:[%s3934_s7 + $0x320] ss:$8 sps:$4 sm:$0xff]   ;;  %v3044_v20 = vld [vmem:[%s3934_s7 + $0x334] ss:$8 sps:$4 sm:$0xff]   ;;  %v3039_v21 = vld [vmem:[%s3934_s7 + $0x230] ss:$8 sps:$4 sm:$0xff]  }
  0xe5   : > { %2011 = vmatpush1.bf16.msra.mxu1 %v2962_v28  ;;  %1971 = vmatprep.subr.bf16.mxu0 %v2963_v29  ;;  %v3042_v22 = vld [vmem:[%s3934_s7 + $0x330] ss:$8 sps:$4 sm:$0xff]   ;;  %v3047_v23 = vld [vmem:[%s3934_s7 + $0x244] ss:$8 sps:$4 sm:$0xff]   ;;  %v3045_v25 = vld [vmem:[%s3934_s7 + $0x240] ss:$8 sps:$4 sm:$0xff]  }
  0xe6   : > { %2012 = vmatprep.subr.bf16.mxu1 %v2965_v30  ;;  %v3050_v24 = vld [vmem:[%s3934_s7 + $0x344] ss:$8 sps:$4 sm:$0xff]   ;;  %v3048_v26 = vld [vmem:[%s3934_s7 + $0x340] ss:$8 sps:$4 sm:$0xff]   ;;  %v3053_v27 = vld [vmem:[%s3934_s7 + $0x254] ss:$8 sps:$4 sm:$0xff]  }
  0xe7   : > { %v3056_v28 = vld [vmem:[%s3934_s7 + $0x354] ss:$8 sps:$4 sm:$0xff]   ;;  %v3051_v29 = vld [vmem:[%s3934_s7 + $0x250] ss:$8 sps:$4 sm:$0xff]   ;;  %v3086_v52 = vld [vmem:[%s3934_s7 + $0x3a4] ss:$8 sps:$4 sm:$0xff]  }
  0xe8   : > { %1972 = vmatpush1.bf16.msra.mxu0 %v2967_v31  ;;  %v3054_v30 = vld [vmem:[%s3934_s7 + $0x350] ss:$8 sps:$4 sm:$0xff]   ;;  %v3059_v31 = vld [vmem:[%s3934_s7 + $0x264] ss:$8 sps:$4 sm:$0xff]   ;;  %v3077_v47 = vld [vmem:[%s3934_s7 + $0x294] ss:$8 sps:$4 sm:$0xff]  }
  0xe9   : > { %2013 = vmatpush1.bf16.msra.mxu1 %v2968_v32  ;;  %1973 = vmatprep.subr.bf16.mxu0 %v2969_v33  ;;  %v3062_v32 = vld [vmem:[%s3934_s7 + $0x364] ss:$8 sps:$4 sm:$0xff]   ;;  %v4054_v33 = vld [vmem:[%s3925_s5 + $0x10] sm:$0xff]  ;;  %p2776_p0 = scmp.ne.s32.totalorder %s4372_s12, 1 }
  0xea   : > { %2014 = vmatprep.subr.bf16.mxu1 %v2971_v34  ;;  %v4057_v34 = vld [vmem:[%s3925_s5 + $0x18] sm:$0xff]  ;;  %vm2332_vm2 = vcmask (!%p2776_p0), 7168  }
  0xeb   : > { %v3080_v48 = vld [vmem:[%s3934_s7 + $0x394] ss:$8 sps:$4 sm:$0xff]   ;;  %v3075_v49 = vld [vmem:[%s3934_s7 + $0x290] ss:$8 sps:$4 sm:$0xff]  }
  0xec   : > { %1974 = vmatpush1.bf16.msra.mxu0 %v2973_v35  ;;  %v3057_v35 = vld [vmem:[%s3934_s7 + $0x260] ss:$8 sps:$4 sm:$0xff]  }
  0xed   : > { %2015 = vmatpush1.bf16.msra.mxu1 %v2974_v36  ;;  %1975 = vmatprep.subr.bf16.mxu0 %v2975_v37  ;;  %v3060_v36 = vld [vmem:[%s3934_s7 + $0x360] ss:$8 sps:$4 sm:$0xff]   ;;  %v2509_v37 = vcombine.high %v4054_v33, %v4054_v33 }
  0xee   : > { %2016 = vmatprep.subr.bf16.mxu1 %v2977_v38  ;;  %v2511_v38 = vcombine.high %v4057_v34, %v4057_v34 }
  0xf0   : > { %1976 = vmatpush1.bf16.msra.mxu0 %v2979_v39  ;;  %v3065_v39 = vld [vmem:[%s3934_s7 + $0x274] ss:$8 sps:$4 sm:$0xff]  }
  0xf1   : > { %2017 = vmatpush1.bf16.msra.mxu1 %v2980_v40  ;;  %1977 = vmatprep.subr.bf16.mxu0 %v2981_v41  ;;  %v3068_v40 = vld [vmem:[%s3934_s7 + $0x374] ss:$8 sps:$4 sm:$0xff]   ;;  %v3063_v41 = vld [vmem:[%s3934_s7 + $0x270] ss:$8 sps:$4 sm:$0xff]  }
  0xf2   : > { %2018 = vmatprep.subr.bf16.mxu1 %v2983_v42  ;;  %v3066_v42 = vld [vmem:[%s3934_s7 + $0x370] ss:$8 sps:$4 sm:$0xff]  }
  0xf4   : > { %1978 = vmatpush1.bf16.msra.mxu0 %v2985_v43  ;;  %v3071_v43 = vld [vmem:[%s3934_s7 + $0x284] ss:$8 sps:$4 sm:$0xff]  }
  0xf5   : > { %2019 = vmatpush1.bf16.msra.mxu1 %v2986_v44  ;;  %1979 = vmatprep.subr.bf16.mxu0 %v2987_v45  ;;  %v3074_v44 = vld [vmem:[%s3934_s7 + $0x384] ss:$8 sps:$4 sm:$0xff]   ;;  %v3069_v45 = vld [vmem:[%s3934_s7 + $0x280] ss:$8 sps:$4 sm:$0xff]  }
  0xf6   : > { %2020 = vmatprep.subr.bf16.mxu1 %v2989_v46  ;;  %v3072_v46 = vld [vmem:[%s3934_s7 + $0x380] ss:$8 sps:$4 sm:$0xff]  }
  0xf8   : > { %1980 = vmatpush1.bf16.msra.mxu0 %v2991_v50  ;;  %v3078_v50 = vld [vmem:[%s3934_s7 + $0x390] ss:$8 sps:$4 sm:$0xff]  }
  0xf9   : > { %2021 = vmatpush1.bf16.msra.mxu1 %v2992_v51  ;;  %1981 = vmatprep.subr.bf16.mxu0 %v2993_v53  ;;  %v3083_v51 = vld [vmem:[%s3934_s7 + $0x2a4] ss:$8 sps:$4 sm:$0xff]   ;;  %v3081_v53 = vld [vmem:[%s3934_s7 + $0x2a0] ss:$8 sps:$4 sm:$0xff]  }
  0xfa   : > { %2022 = vmatprep.subr.bf16.mxu1 %v2995_v54  ;;  %v3084_v54 = vld [vmem:[%s3934_s7 + $0x3a0] ss:$8 sps:$4 sm:$0xff]  }
  0xfc   : > { %1982 = vmatpush1.bf16.msra.mxu0 %v2997_v55  ;;  %v3089_v55 = vld [vmem:[%s3934_s7 + $0x2b4] ss:$8 sps:$4 sm:$0xff]  }
  0xfd   : > { %2023 = vmatpush1.bf16.msra.mxu1 %v2998_v56  ;;  %1983 = vmatprep.subr.bf16.mxu0 %v2999_v57  ;;  %v3092_v56 = vld [vmem:[%s3934_s7 + $0x3b4] ss:$8 sps:$4 sm:$0xff]   ;;  %v3087_v57 = vld [vmem:[%s3934_s7 + $0x2b0] ss:$8 sps:$4 sm:$0xff]  }
  0xfe   : > { %2024 = vmatprep.subr.bf16.mxu1 %v3001_v58  ;;  %v3090_v58 = vld [vmem:[%s3934_s7 + $0x3b0] ss:$8 sps:$4 sm:$0xff]  }
 0x100   : > { %1984 = vmatpush1.bf16.msra.mxu0 %v3003_v59  ;;  %v3095_v59 = vld [vmem:[%s3934_s7 + $0x2c4] ss:$8 sps:$4 sm:$0xff]  }
 0x101   : > { %2025 = vmatpush1.bf16.msra.mxu1 %v3004_v60  ;;  %1985 = vmatprep.subr.bf16.mxu0 %v3005_v61  ;;  %v3098_v60 = vld [vmem:[%s3934_s7 + $0x3c4] ss:$8 sps:$4 sm:$0xff]   ;;  %v3093_v61 = vld [vmem:[%s3934_s7 + $0x2c0] ss:$8 sps:$4 sm:$0xff]  }
 0x102   : > { %2026 = vmatprep.subr.bf16.mxu1 %v3007_v62  ;;  %v3096_v62 = vld [vmem:[%s3934_s7 + $0x3c0] ss:$8 sps:$4 sm:$0xff]  }
 0x104   : > { %1986 = vmatpush1.bf16.msra.mxu0 %v3009_v63  ;;  %v3101_v63 = vld [vmem:[%s3934_s7 + $0x2d4] ss:$8 sps:$4 sm:$0xff]  }
 0x105   : > { %2027 = vmatpush1.bf16.msra.mxu1 %v3010_v0  ;;  %1987 = vmatprep.subr.bf16.mxu0 %v3011_v1  ;;  %v3104_v0 = vld [vmem:[%s3934_s7 + $0x3d4] ss:$8 sps:$4 sm:$0xff]   ;;  %v3099_v1 = vld [vmem:[%s3934_s7 + $0x2d0] ss:$8 sps:$4 sm:$0xff]  }
 0x106   : > { %2028 = vmatprep.subr.bf16.mxu1 %v3013_v2  ;;  %v3102_v2 = vld [vmem:[%s3934_s7 + $0x3d0] ss:$8 sps:$4 sm:$0xff]  }
 0x108   : > { %1988 = vmatpush1.bf16.msra.mxu0 %v3015_v3  ;;  %v3107_v3 = vld [vmem:[%s3934_s7 + $0x2e4] ss:$8 sps:$4 sm:$0xff]  }
 0x109   : > { %2029 = vmatpush1.bf16.msra.mxu1 %v3016_v4  ;;  %2039 = vmatprep.subr.bf16.mxu0 %v3023_v5  ;;  %v3110_v4 = vld [vmem:[%s3934_s7 + $0x3e4] ss:$8 sps:$4 sm:$0xff]   ;;  %v3105_v5 = vld [vmem:[%s3934_s7 + $0x2e0] ss:$8 sps:$4 sm:$0xff]  }
 0x10a   : > { %2080 = vmatprep.subr.bf16.mxu1 %v3026_v6  ;;  %v3108_v6 = vld [vmem:[%s3934_s7 + $0x3e0] ss:$8 sps:$4 sm:$0xff]  }
 0x10b   : > { %1990 = vmatmul.mubr.bf16.vlgmr.msra.gmra.mrb[0].mxu0 %v2504_v7  ;;  %v3113_v7 = vld [vmem:[%s3934_s7 + $0x2f4] ss:$8 sps:$4 sm:$0xff]  }
 0x10c   : > { %2031 = vmatmul.mubr.bf16.vlgmr.msra.gmra.mrb[0].mxu1 %v2506_v8  ;;  %2040 = vmatpush1.bf16.msra.mxu0 %v3021_v9  ;;  %v3116_v8 = vld [vmem:[%s3934_s7 + $0x3f4] ss:$8 sps:$4 sm:$0xff]   ;;  %v3111_v9 = vld [vmem:[%s3934_s7 + $0x2f0] ss:$8 sps:$4 sm:$0xff]  }
 0x10d   : > { %2081 = vmatpush1.bf16.msra.mxu1 %v3024_v10  ;;  %2041 = vmatprep.subr.bf16.mxu0 %v3029_v11  ;;  %v3114_v10 = vld [vmem:[%s3934_s7 + $0x3f0] ss:$8 sps:$4 sm:$0xff]   ;;  %v3123_v11 = vld [vmem:[%s3934_s7 + $0x404] ss:$8 sps:$4 sm:$0xff]  }
 0x10e   : > { %2082 = vmatprep.subr.bf16.mxu1 %v3032_v12  ;;  %2071 = vmatprep.mubr.bf16.mxu0 %v2509_v37  ;;  %v3126_v12 = vld [vmem:[%s3934_s7 + $0x504] ss:$8 sps:$4 sm:$0xff]   ;;  %v3153_v37 = vld [vmem:[%s3934_s7 + $0x454] ss:$8 sps:$4 sm:$0xff]  }
 0x10f   : > { %2112 = vmatprep.mubr.bf16.mxu1 %v2511_v38  ;;  %v3156_v38 = vld [vmem:[%s3934_s7 + $0x554] ss:$8 sps:$4 sm:$0xff]  }
 0x110   : > { %2042 = vmatpush1.bf16.msra.mxu0 %v3027_v13  ;;  %v2508_v13 = vcombine.low %v4054_v33, %v4054_v33  ;;  %v3147_v33 = vld [vmem:[%s3934_s7 + $0x444] ss:$8 sps:$4 sm:$0xff]  }
 0x111   : > { %2083 = vmatpush1.bf16.msra.mxu1 %v3030_v14  ;;  %2043 = vmatprep.subr.bf16.mxu0 %v3035_v15  ;;  %v2510_v14 = vcombine.low %v4057_v34, %v4057_v34  ;;  %v3121_v15 = vld [vmem:[%s3934_s7 + $0x400] ss:$8 sps:$4 sm:$0xff]   ;;  %v3150_v34 = vld [vmem:[%s3934_s7 + $0x544] ss:$8 sps:$4 sm:$0xff]  }
 0x112   : > { %2084 = vmatprep.subr.bf16.mxu1 %v3038_v16  ;;  %v3124_v16 = vld [vmem:[%s3934_s7 + $0x500] ss:$8 sps:$4 sm:$0xff]  }
 0x114   : > { %2044 = vmatpush1.bf16.msra.mxu0 %v3033_v17  ;;  %v3129_v17 = vld [vmem:[%s3934_s7 + $0x414] ss:$8 sps:$4 sm:$0xff]  }
 0x115   : > { %2085 = vmatpush1.bf16.msra.mxu1 %v3036_v18  ;;  %2045 = vmatprep.subr.bf16.mxu0 %v3041_v19  ;;  %v3132_v18 = vld [vmem:[%s3934_s7 + $0x514] ss:$8 sps:$4 sm:$0xff]   ;;  %v4112_v19 = vld [vmem:[%s3925_s5 + $0x20] sm:$0xff] }
 0x116   : > { %2086 = vmatprep.subr.bf16.mxu1 %v3044_v20  ;;  %v4115_v20 = vld [vmem:[%s3925_s5 + $0x28] sm:$0xff] }
 0x118   : > { %2046 = vmatpush1.bf16.msra.mxu0 %v3039_v21  ;;  %v2513_v21 = vcombine.high %v4112_v19, %v4112_v19 }
 0x119   : > { %2087 = vmatpush1.bf16.msra.mxu1 %v3042_v22  ;;  %2047 = vmatprep.subr.bf16.mxu0 %v3047_v23  ;;  %v2515_v22 = vcombine.high %v4115_v20, %v4115_v20  ;;  %v3127_v23 = vld [vmem:[%s3934_s7 + $0x410] ss:$8 sps:$4 sm:$0xff]  }
 0x11a   : > { %2088 = vmatprep.subr.bf16.mxu1 %v3050_v24  ;;  %v3130_v24 = vld [vmem:[%s3934_s7 + $0x510] ss:$8 sps:$4 sm:$0xff]  }
 0x11c   : > { %2048 = vmatpush1.bf16.msra.mxu0 %v3045_v25  ;;  %v3135_v25 = vld [vmem:[%s3934_s7 + $0x424] ss:$8 sps:$4 sm:$0xff]  }
 0x11d   : > { %2089 = vmatpush1.bf16.msra.mxu1 %v3048_v26  ;;  %2049 = vmatprep.subr.bf16.mxu0 %v3053_v27  ;;  %v3138_v26 = vld [vmem:[%s3934_s7 + $0x524] ss:$8 sps:$4 sm:$0xff]   ;;  %v3133_v27 = vld [vmem:[%s3934_s7 + $0x420] ss:$8 sps:$4 sm:$0xff]  }
 0x11e   : > { %2090 = vmatprep.subr.bf16.mxu1 %v3056_v28  ;;  %v3136_v28 = vld [vmem:[%s3934_s7 + $0x520] ss:$8 sps:$4 sm:$0xff]  }
 0x120   : > { %2050 = vmatpush1.bf16.msra.mxu0 %v3051_v29  ;;  %v3141_v29 = vld [vmem:[%s3934_s7 + $0x434] ss:$8 sps:$4 sm:$0xff]  }
 0x121   : > { %2091 = vmatpush1.bf16.msra.mxu1 %v3054_v30  ;;  %2051 = vmatprep.subr.bf16.mxu0 %v3059_v31  ;;  %v3144_v30 = vld [vmem:[%s3934_s7 + $0x534] ss:$8 sps:$4 sm:$0xff]   ;;  %v3139_v31 = vld [vmem:[%s3934_s7 + $0x430] ss:$8 sps:$4 sm:$0xff]  }
 0x122   : > { %2092 = vmatprep.subr.bf16.mxu1 %v3062_v32  ;;  %v3142_v32 = vld [vmem:[%s3934_s7 + $0x530] ss:$8 sps:$4 sm:$0xff]  }
 0x124   : > { %2052 = vmatpush1.bf16.msra.mxu0 %v3057_v35  ;;  %v3145_v35 = vld [vmem:[%s3934_s7 + $0x440] ss:$8 sps:$4 sm:$0xff]  }
 0x125   : > { %2093 = vmatpush1.bf16.msra.mxu1 %v3060_v36  ;;  %2053 = vmatprep.subr.bf16.mxu0 %v3065_v39  ;;  %v3148_v36 = vld [vmem:[%s3934_s7 + $0x540] ss:$8 sps:$4 sm:$0xff]   ;;  %v3151_v39 = vld [vmem:[%s3934_s7 + $0x450] ss:$8 sps:$4 sm:$0xff]  }
 0x126   : > { %2094 = vmatprep.subr.bf16.mxu1 %v3068_v40  ;;  %v3154_v40 = vld [vmem:[%s3934_s7 + $0x550] ss:$8 sps:$4 sm:$0xff]  }
 0x128   : > { %2054 = vmatpush1.bf16.msra.mxu0 %v3063_v41  ;;  %v3159_v41 = vld [vmem:[%s3934_s7 + $0x464] ss:$8 sps:$4 sm:$0xff]  }
 0x129   : > { %2095 = vmatpush1.bf16.msra.mxu1 %v3066_v42  ;;  %2055 = vmatprep.subr.bf16.mxu0 %v3071_v43  ;;  %v3162_v42 = vld [vmem:[%s3934_s7 + $0x564] ss:$8 sps:$4 sm:$0xff]   ;;  %v3157_v43 = vld [vmem:[%s3934_s7 + $0x460] ss:$8 sps:$4 sm:$0xff]  }
 0x12a   : > { %2096 = vmatprep.subr.bf16.mxu1 %v3074_v44  ;;  %v3160_v44 = vld [vmem:[%s3934_s7 + $0x560] ss:$8 sps:$4 sm:$0xff]  }
 0x12c   : > { %2056 = vmatpush1.bf16.msra.mxu0 %v3069_v45  ;;  %v3165_v45 = vld [vmem:[%s3934_s7 + $0x474] ss:$8 sps:$4 sm:$0xff]  }
 0x12d   : > { %2097 = vmatpush1.bf16.msra.mxu1 %v3072_v46  ;;  %2057 = vmatprep.subr.bf16.mxu0 %v3077_v47  ;;  %v3168_v46 = vld [vmem:[%s3934_s7 + $0x574] ss:$8 sps:$4 sm:$0xff]   ;;  %v3163_v47 = vld [vmem:[%s3934_s7 + $0x470] ss:$8 sps:$4 sm:$0xff]  }
 0x12e   : > { %2098 = vmatprep.subr.bf16.mxu1 %v3080_v48  ;;  %v3166_v48 = vld [vmem:[%s3934_s7 + $0x570] ss:$8 sps:$4 sm:$0xff]  }
 0x130   : > { %2058 = vmatpush1.bf16.msra.mxu0 %v3075_v49  ;;  %v3171_v49 = vld [vmem:[%s3934_s7 + $0x484] ss:$8 sps:$4 sm:$0xff]  }
 0x131   : > { %2099 = vmatpush1.bf16.msra.mxu1 %v3078_v50  ;;  %2059 = vmatprep.subr.bf16.mxu0 %v3083_v51  ;;  %v3174_v50 = vld [vmem:[%s3934_s7 + $0x584] ss:$8 sps:$4 sm:$0xff]   ;;  %v3169_v51 = vld [vmem:[%s3934_s7 + $0x480] ss:$8 sps:$4 sm:$0xff]  }
 0x132   : > { %2100 = vmatprep.subr.bf16.mxu1 %v3086_v52  ;;  %v3172_v52 = vld [vmem:[%s3934_s7 + $0x580] ss:$8 sps:$4 sm:$0xff]  }
 0x134   : > { %2060 = vmatpush1.bf16.msra.mxu0 %v3081_v53  ;;  %v3177_v53 = vld [vmem:[%s3934_s7 + $0x494] ss:$8 sps:$4 sm:$0xff]  }
 0x135   : > { %2101 = vmatpush1.bf16.msra.mxu1 %v3084_v54  ;;  %2061 = vmatprep.subr.bf16.mxu0 %v3089_v55  ;;  %v3180_v54 = vld [vmem:[%s3934_s7 + $0x594] ss:$8 sps:$4 sm:$0xff]   ;;  %v3175_v55 = vld [vmem:[%s3934_s7 + $0x490] ss:$8 sps:$4 sm:$0xff]  }
 0x136   : > { %2102 = vmatprep.subr.bf16.mxu1 %v3092_v56  ;;  %v3178_v56 = vld [vmem:[%s3934_s7 + $0x590] ss:$8 sps:$4 sm:$0xff]  }
 0x138   : > { %2062 = vmatpush1.bf16.msra.mxu0 %v3087_v57  ;;  %v3183_v57 = vld [vmem:[%s3934_s7 + $0x4a4] ss:$8 sps:$4 sm:$0xff]  }
 0x139   : > { %2103 = vmatpush1.bf16.msra.mxu1 %v3090_v58  ;;  %2063 = vmatprep.subr.bf16.mxu0 %v3095_v59  ;;  %v3186_v58 = vld [vmem:[%s3934_s7 + $0x5a4] ss:$8 sps:$4 sm:$0xff]   ;;  %v3181_v59 = vld [vmem:[%s3934_s7 + $0x4a0] ss:$8 sps:$4 sm:$0xff]  }
 0x13a   : > { %2104 = vmatprep.subr.bf16.mxu1 %v3098_v60  ;;  %v3184_v60 = vld [vmem:[%s3934_s7 + $0x5a0] ss:$8 sps:$4 sm:$0xff]  }
 0x13c   : > { %2064 = vmatpush1.bf16.msra.mxu0 %v3093_v61  ;;  %v3189_v61 = vld [vmem:[%s3934_s7 + $0x4b4] ss:$8 sps:$4 sm:$0xff]  }
 0x13d   : > { %2105 = vmatpush1.bf16.msra.mxu1 %v3096_v62  ;;  %2065 = vmatprep.subr.bf16.mxu0 %v3101_v63  ;;  %v3192_v62 = vld [vmem:[%s3934_s7 + $0x5b4] ss:$8 sps:$4 sm:$0xff]   ;;  %v3187_v63 = vld [vmem:[%s3934_s7 + $0x4b0] ss:$8 sps:$4 sm:$0xff]  }
 0x13e   : > { %2106 = vmatprep.subr.bf16.mxu1 %v3104_v0  ;;  %v3190_v0 = vld [vmem:[%s3934_s7 + $0x5b0] ss:$8 sps:$4 sm:$0xff]  }
 0x140   : > { %2066 = vmatpush1.bf16.msra.mxu0 %v3099_v1  ;;  %v3195_v1 = vld [vmem:[%s3934_s7 + $0x4c4] ss:$8 sps:$4 sm:$0xff]  }
 0x141   : > { %2107 = vmatpush1.bf16.msra.mxu1 %v3102_v2  ;;  %2067 = vmatprep.subr.bf16.mxu0 %v3107_v3  ;;  %v3198_v2 = vld [vmem:[%s3934_s7 + $0x5c4] ss:$8 sps:$4 sm:$0xff]   ;;  %v3193_v3 = vld [vmem:[%s3934_s7 + $0x4c0] ss:$8 sps:$4 sm:$0xff]  }
 0x142   : > { %2108 = vmatprep.subr.bf16.mxu1 %v3110_v4  ;;  %v3196_v4 = vld [vmem:[%s3934_s7 + $0x5c0] ss:$8 sps:$4 sm:$0xff]  }
 0x144   : > { %2068 = vmatpush1.bf16.msra.mxu0 %v3105_v5  ;;  %v3201_v5 = vld [vmem:[%s3934_s7 + $0x4d4] ss:$8 sps:$4 sm:$0xff]  }
 0x145   : > { %2109 = vmatpush1.bf16.msra.mxu1 %v3108_v6  ;;  %2069 = vmatprep.subr.bf16.mxu0 %v3113_v7  ;;  %v3204_v6 = vld [vmem:[%s3934_s7 + $0x5d4] ss:$8 sps:$4 sm:$0xff]   ;;  %v3199_v7 = vld [vmem:[%s3934_s7 + $0x4d0] ss:$8 sps:$4 sm:$0xff]  }
 0x146   : > { %2110 = vmatprep.subr.bf16.mxu1 %v3116_v8  ;;  %v3202_v8 = vld [vmem:[%s3934_s7 + $0x5d0] ss:$8 sps:$4 sm:$0xff]  }
 0x148   : > { %2070 = vmatpush1.bf16.msra.mxu0 %v3111_v9  ;;  %v3207_v9 = vld [vmem:[%s3934_s7 + $0x4e4] ss:$8 sps:$4 sm:$0xff]  }
 0x149   : > { %2111 = vmatpush1.bf16.msra.mxu1 %v3114_v10  ;;  %2121 = vmatprep.subr.bf16.mxu0 %v3123_v11  ;;  %v3210_v10 = vld [vmem:[%s3934_s7 + $0x5e4] ss:$8 sps:$4 sm:$0xff]   ;;  %v3205_v11 = vld [vmem:[%s3934_s7 + $0x4e0] ss:$8 sps:$4 sm:$0xff]  }
 0x14a   : > { %2162 = vmatprep.subr.bf16.mxu1 %v3126_v12  ;;  %v3208_v12 = vld [vmem:[%s3934_s7 + $0x5e0] ss:$8 sps:$4 sm:$0xff]  }
 0x14b   : > { %2072 = vmatmul.mubr.bf16.vlgmr.msra.gmra.mrb[4].mxu0 %v2508_v13  ;;  %v3213_v13 = vld [vmem:[%s3934_s7 + $0x4f4] ss:$8 sps:$4 sm:$0xff]  }
 0x14c   : > { %2113 = vmatmul.mubr.bf16.vlgmr.msra.gmra.mrb[4].mxu1 %v2510_v14  ;;  %2122 = vmatpush1.bf16.msra.mxu0 %v3121_v15  ;;  %v3216_v14 = vld [vmem:[%s3934_s7 + $0x5f4] ss:$8 sps:$4 sm:$0xff]   ;;  %v3211_v15 = vld [vmem:[%s3934_s7 + $0x4f0] ss:$8 sps:$4 sm:$0xff]  }
 0x14d   : > { %2163 = vmatpush1.bf16.msra.mxu1 %v3124_v16  ;;  %2123 = vmatprep.subr.bf16.mxu0 %v3129_v17  ;;  %v3214_v16 = vld [vmem:[%s3934_s7 + $0x5f0] ss:$8 sps:$4 sm:$0xff]   ;;  %v3223_v17 = vld [vmem:[%s3934_s7 + $0x604] ss:$8 sps:$4 sm:$0xff]  }
 0x14e   : > { %2164 = vmatprep.subr.bf16.mxu1 %v3132_v18  ;;  %2153 = vmatprep.mubr.bf16.mxu0 %v2513_v21  ;;  %v3226_v18 = vld [vmem:[%s3934_s7 + $0x704] ss:$8 sps:$4 sm:$0xff]   ;;  %v2512_v21 = vcombine.low %v4112_v19, %v4112_v19 }
 0x14f   : > { %2194 = vmatprep.mubr.bf16.mxu1 %v2515_v22  ;;  %v2514_v22 = vcombine.low %v4115_v20, %v4115_v20 }
 0x150   : > { %2124 = vmatpush1.bf16.msra.mxu0 %v3127_v23  ;;  %v4186_v23 = vld [vmem:[%s3925_s5 + $0x30] sm:$0xff] }
 0x151   : > { %2165 = vmatpush1.bf16.msra.mxu1 %v3130_v24  ;;  %2125 = vmatprep.subr.bf16.mxu0 %v3135_v25  ;;  %v4189_v24 = vld [vmem:[%s3925_s5 + $0x38] sm:$0xff]  ;;  %v3221_v25 = vld [vmem:[%s3934_s7 + $0x600] ss:$8 sps:$4 sm:$0xff]   ;;  %v2517_v19 = vcombine.high %v4186_v23, %v4186_v23 }
 0x152   : > { %2166 = vmatprep.subr.bf16.mxu1 %v3138_v26  ;;  %v3224_v26 = vld [vmem:[%s3934_s7 + $0x700] ss:$8 sps:$4 sm:$0xff]   ;;  %v2519_v20 = vcombine.high %v4189_v24, %v4189_v24 }
 0x154   : > { %2126 = vmatpush1.bf16.msra.mxu0 %v3133_v27  ;;  %v3229_v27 = vld [vmem:[%s3934_s7 + $0x614] ss:$8 sps:$4 sm:$0xff]  }
 0x155   : > { %2167 = vmatpush1.bf16.msra.mxu1 %v3136_v28  ;;  %2127 = vmatprep.subr.bf16.mxu0 %v3141_v29  ;;  %v3232_v28 = vld [vmem:[%s3934_s7 + $0x714] ss:$8 sps:$4 sm:$0xff]   ;;  %v3227_v29 = vld [vmem:[%s3934_s7 + $0x610] ss:$8 sps:$4 sm:$0xff]  }
 0x156   : > { %2168 = vmatprep.subr.bf16.mxu1 %v3144_v30  ;;  %v3230_v30 = vld [vmem:[%s3934_s7 + $0x710] ss:$8 sps:$4 sm:$0xff]  }
 0x158   : > { %2128 = vmatpush1.bf16.msra.mxu0 %v3139_v31  ;;  %v3235_v31 = vld [vmem:[%s3934_s7 + $0x624] ss:$8 sps:$4 sm:$0xff]  }
 0x159   : > { %2169 = vmatpush1.bf16.msra.mxu1 %v3142_v32  ;;  %2129 = vmatprep.subr.bf16.mxu0 %v3147_v33  ;;  %v3238_v32 = vld [vmem:[%s3934_s7 + $0x724] ss:$8 sps:$4 sm:$0xff]   ;;  %v3233_v33 = vld [vmem:[%s3934_s7 + $0x620] ss:$8 sps:$4 sm:$0xff]  }
 0x15a   : > { %2170 = vmatprep.subr.bf16.mxu1 %v3150_v34  ;;  %v3236_v34 = vld [vmem:[%s3934_s7 + $0x720] ss:$8 sps:$4 sm:$0xff]  }
 0x15c   : > { %2130 = vmatpush1.bf16.msra.mxu0 %v3145_v35  ;;  %v3241_v35 = vld [vmem:[%s3934_s7 + $0x634] ss:$8 sps:$4 sm:$0xff]  }
 0x15d   : > { %2171 = vmatpush1.bf16.msra.mxu1 %v3148_v36  ;;  %2131 = vmatprep.subr.bf16.mxu0 %v3153_v37  ;;  %v3244_v36 = vld [vmem:[%s3934_s7 + $0x734] ss:$8 sps:$4 sm:$0xff]   ;;  %v3239_v37 = vld [vmem:[%s3934_s7 + $0x630] ss:$8 sps:$4 sm:$0xff]  }
 0x15e   : > { %2172 = vmatprep.subr.bf16.mxu1 %v3156_v38  ;;  %v3242_v38 = vld [vmem:[%s3934_s7 + $0x730] ss:$8 sps:$4 sm:$0xff]  }
 0x160   : > { %2132 = vmatpush1.bf16.msra.mxu0 %v3151_v39  ;;  %v3247_v39 = vld [vmem:[%s3934_s7 + $0x644] ss:$8 sps:$4 sm:$0xff]  }
 0x161   : > { %2173 = vmatpush1.bf16.msra.mxu1 %v3154_v40  ;;  %2133 = vmatprep.subr.bf16.mxu0 %v3159_v41  ;;  %v3250_v40 = vld [vmem:[%s3934_s7 + $0x744] ss:$8 sps:$4 sm:$0xff]   ;;  %v3245_v41 = vld [vmem:[%s3934_s7 + $0x640] ss:$8 sps:$4 sm:$0xff]  }
 0x162   : > { %2174 = vmatprep.subr.bf16.mxu1 %v3162_v42  ;;  %v3248_v42 = vld [vmem:[%s3934_s7 + $0x740] ss:$8 sps:$4 sm:$0xff]  }
 0x164   : > { %2134 = vmatpush1.bf16.msra.mxu0 %v3157_v43  ;;  %v3253_v43 = vld [vmem:[%s3934_s7 + $0x654] ss:$8 sps:$4 sm:$0xff]  }
 0x165   : > { %2175 = vmatpush1.bf16.msra.mxu1 %v3160_v44  ;;  %2135 = vmatprep.subr.bf16.mxu0 %v3165_v45  ;;  %v3256_v44 = vld [vmem:[%s3934_s7 + $0x754] ss:$8 sps:$4 sm:$0xff]   ;;  %v3251_v45 = vld [vmem:[%s3934_s7 + $0x650] ss:$8 sps:$4 sm:$0xff]  }
 0x166   : > { %2176 = vmatprep.subr.bf16.mxu1 %v3168_v46  ;;  %v3254_v46 = vld [vmem:[%s3934_s7 + $0x750] ss:$8 sps:$4 sm:$0xff]  }
 0x168   : > { %2136 = vmatpush1.bf16.msra.mxu0 %v3163_v47  ;;  %v3259_v47 = vld [vmem:[%s3934_s7 + $0x664] ss:$8 sps:$4 sm:$0xff]  }
 0x169   : > { %2177 = vmatpush1.bf16.msra.mxu1 %v3166_v48  ;;  %2137 = vmatprep.subr.bf16.mxu0 %v3171_v49  ;;  %v3262_v48 = vld [vmem:[%s3934_s7 + $0x764] ss:$8 sps:$4 sm:$0xff]   ;;  %v3257_v49 = vld [vmem:[%s3934_s7 + $0x660] ss:$8 sps:$4 sm:$0xff]  }
 0x16a   : > { %2178 = vmatprep.subr.bf16.mxu1 %v3174_v50  ;;  %v3260_v50 = vld [vmem:[%s3934_s7 + $0x760] ss:$8 sps:$4 sm:$0xff]  }
 0x16c   : > { %2138 = vmatpush1.bf16.msra.mxu0 %v3169_v51  ;;  %v3265_v51 = vld [vmem:[%s3934_s7 + $0x674] ss:$8 sps:$4 sm:$0xff]  }
 0x16d   : > { %2179 = vmatpush1.bf16.msra.mxu1 %v3172_v52  ;;  %2139 = vmatprep.subr.bf16.mxu0 %v3177_v53  ;;  %v3268_v52 = vld [vmem:[%s3934_s7 + $0x774] ss:$8 sps:$4 sm:$0xff]   ;;  %v3263_v53 = vld [vmem:[%s3934_s7 + $0x670] ss:$8 sps:$4 sm:$0xff]  }
 0x16e   : > { %2180 = vmatprep.subr.bf16.mxu1 %v3180_v54  ;;  %v3266_v54 = vld [vmem:[%s3934_s7 + $0x770] ss:$8 sps:$4 sm:$0xff]  }
 0x170   : > { %2140 = vmatpush1.bf16.msra.mxu0 %v3175_v55  ;;  %v3271_v55 = vld [vmem:[%s3934_s7 + $0x684] ss:$8 sps:$4 sm:$0xff]  }
 0x171   : > { %2181 = vmatpush1.bf16.msra.mxu1 %v3178_v56  ;;  %2141 = vmatprep.subr.bf16.mxu0 %v3183_v57  ;;  %v3274_v56 = vld [vmem:[%s3934_s7 + $0x784] ss:$8 sps:$4 sm:$0xff]   ;;  %v3269_v57 = vld [vmem:[%s3934_s7 + $0x680] ss:$8 sps:$4 sm:$0xff]  }
 0x172   : > { %2182 = vmatprep.subr.bf16.mxu1 %v3186_v58  ;;  %v3272_v58 = vld [vmem:[%s3934_s7 + $0x780] ss:$8 sps:$4 sm:$0xff]  }
 0x174   : > { %2142 = vmatpush1.bf16.msra.mxu0 %v3181_v59  ;;  %v3277_v59 = vld [vmem:[%s3934_s7 + $0x694] ss:$8 sps:$4 sm:$0xff]  }
 0x175   : > { %2183 = vmatpush1.bf16.msra.mxu1 %v3184_v60  ;;  %2143 = vmatprep.subr.bf16.mxu0 %v3189_v61  ;;  %v3280_v60 = vld [vmem:[%s3934_s7 + $0x794] ss:$8 sps:$4 sm:$0xff]   ;;  %v3275_v61 = vld [vmem:[%s3934_s7 + $0x690] ss:$8 sps:$4 sm:$0xff]  }
 0x176   : > { %2184 = vmatprep.subr.bf16.mxu1 %v3192_v62  ;;  %v3278_v62 = vld [vmem:[%s3934_s7 + $0x790] ss:$8 sps:$4 sm:$0xff]  }
 0x178   : > { %2144 = vmatpush1.bf16.msra.mxu0 %v3187_v63  ;;  %v3283_v63 = vld [vmem:[%s3934_s7 + $0x6a4] ss:$8 sps:$4 sm:$0xff]  }
 0x179   : > { %2185 = vmatpush1.bf16.msra.mxu1 %v3190_v0  ;;  %2145 = vmatprep.subr.bf16.mxu0 %v3195_v1  ;;  %v3286_v0 = vld [vmem:[%s3934_s7 + $0x7a4] ss:$8 sps:$4 sm:$0xff]   ;;  %v3281_v1 = vld [vmem:[%s3934_s7 + $0x6a0] ss:$8 sps:$4 sm:$0xff]  }
 0x17a   : > { %2186 = vmatprep.subr.bf16.mxu1 %v3198_v2  ;;  %v3284_v2 = vld [vmem:[%s3934_s7 + $0x7a0] ss:$8 sps:$4 sm:$0xff]  }
 0x17c   : > { %2146 = vmatpush1.bf16.msra.mxu0 %v3193_v3  ;;  %v3289_v3 = vld [vmem:[%s3934_s7 + $0x6b4] ss:$8 sps:$4 sm:$0xff]  }
 0x17d   : > { %2187 = vmatpush1.bf16.msra.mxu1 %v3196_v4  ;;  %2147 = vmatprep.subr.bf16.mxu0 %v3201_v5  ;;  %v3292_v4 = vld [vmem:[%s3934_s7 + $0x7b4] ss:$8 sps:$4 sm:$0xff]   ;;  %v3287_v5 = vld [vmem:[%s3934_s7 + $0x6b0] ss:$8 sps:$4 sm:$0xff]  }
 0x17e   : > { %2188 = vmatprep.subr.bf16.mxu1 %v3204_v6  ;;  %v3290_v6 = vld [vmem:[%s3934_s7 + $0x7b0] ss:$8 sps:$4 sm:$0xff]  }
 0x180   : > { %2148 = vmatpush1.bf16.msra.mxu0 %v3199_v7  ;;  %v3295_v7 = vld [vmem:[%s3934_s7 + $0x6c4] ss:$8 sps:$4 sm:$0xff]  }
 0x181   : > { %2189 = vmatpush1.bf16.msra.mxu1 %v3202_v8  ;;  %2149 = vmatprep.subr.bf16.mxu0 %v3207_v9  ;;  %v3298_v8 = vld [vmem:[%s3934_s7 + $0x7c4] ss:$8 sps:$4 sm:$0xff]   ;;  %v3293_v9 = vld [vmem:[%s3934_s7 + $0x6c0] ss:$8 sps:$4 sm:$0xff]  }
 0x182   : > { %2190 = vmatprep.subr.bf16.mxu1 %v3210_v10  ;;  %v3296_v10 = vld [vmem:[%s3934_s7 + $0x7c0] ss:$8 sps:$4 sm:$0xff]  }
 0x184   : > { %2150 = vmatpush1.bf16.msra.mxu0 %v3205_v11  ;;  %v3301_v11 = vld [vmem:[%s3934_s7 + $0x6d4] ss:$8 sps:$4 sm:$0xff]  }
 0x185   : > { %2191 = vmatpush1.bf16.msra.mxu1 %v3208_v12  ;;  %2151 = vmatprep.subr.bf16.mxu0 %v3213_v13  ;;  %v3304_v12 = vld [vmem:[%s3934_s7 + $0x7d4] ss:$8 sps:$4 sm:$0xff]   ;;  %v3299_v13 = vld [vmem:[%s3934_s7 + $0x6d0] ss:$8 sps:$4 sm:$0xff]  }
 0x186   : > { %2192 = vmatprep.subr.bf16.mxu1 %v3216_v14  ;;  %v3302_v14 = vld [vmem:[%s3934_s7 + $0x7d0] ss:$8 sps:$4 sm:$0xff]  }
 0x188   : > { %2152 = vmatpush1.bf16.msra.mxu0 %v3211_v15  ;;  %v3307_v15 = vld [vmem:[%s3934_s7 + $0x6e4] ss:$8 sps:$4 sm:$0xff]  }
 0x189   : > { %2193 = vmatpush1.bf16.msra.mxu1 %v3214_v16  ;;  %2203 = vmatprep.subr.bf16.mxu0 %v3223_v17  ;;  %v3310_v16 = vld [vmem:[%s3934_s7 + $0x7e4] ss:$8 sps:$4 sm:$0xff]   ;;  %v3305_v17 = vld [vmem:[%s3934_s7 + $0x6e0] ss:$8 sps:$4 sm:$0xff]  }
 0x18a   : > { %2244 = vmatprep.subr.bf16.mxu1 %v3226_v18  ;;  %v3308_v18 = vld [vmem:[%s3934_s7 + $0x7e0] ss:$8 sps:$4 sm:$0xff]  }
 0x18b   : > { %2154 = vmatmul.mubr.bf16.vlgmr.msra.gmra.mrb[8].mxu0 %v2512_v21  ;;  %v3313_v21 = vld [vmem:[%s3934_s7 + $0x6f4] ss:$8 sps:$4 sm:$0xff]  }
 0x18c   : > { %2195 = vmatmul.mubr.bf16.vlgmr.msra.gmra.mrb[8].mxu1 %v2514_v22  ;;  %2204 = vmatpush1.bf16.msra.mxu0 %v3221_v25  ;;  %v3316_v22 = vld [vmem:[%s3934_s7 + $0x7f4] ss:$8 sps:$4 sm:$0xff]   ;;  %v3311_v25 = vld [vmem:[%s3934_s7 + $0x6f0] ss:$8 sps:$4 sm:$0xff]  }
 0x18d   : > { %2245 = vmatpush1.bf16.msra.mxu1 %v3224_v26  ;;  %2205 = vmatprep.subr.bf16.mxu0 %v3229_v27  ;;  %v3314_v26 = vld [vmem:[%s3934_s7 + $0x7f0] ss:$8 sps:$4 sm:$0xff]   ;;  %v2516_v27 = vcombine.low %v4186_v23, %v4186_v23 }
 0x18e   : > { %2246 = vmatprep.subr.bf16.mxu1 %v3232_v28  ;;  %2235 = vmatprep.mubr.bf16.mxu0 %v2517_v19  ;;  %v2518_v28 = vcombine.low %v4189_v24, %v4189_v24 }
 0x18f   : > { %2276 = vmatprep.mubr.bf16.mxu1 %v2519_v20 }
 0x190   : > { %2206 = vmatpush1.bf16.msra.mxu0 %v3227_v29 }
 0x191   : > { %2247 = vmatpush1.bf16.msra.mxu1 %v3230_v30  ;;  %2207 = vmatprep.subr.bf16.mxu0 %v3235_v31 }
 0x192   : > { %2248 = vmatprep.subr.bf16.mxu1 %v3238_v32 }
 0x194   : > { %2208 = vmatpush1.bf16.msra.mxu0 %v3233_v33 }
 0x195   : > { %2249 = vmatpush1.bf16.msra.mxu1 %v3236_v34  ;;  %2209 = vmatprep.subr.bf16.mxu0 %v3241_v35 }
 0x196   : > { %2250 = vmatprep.subr.bf16.mxu1 %v3244_v36 }
 0x198   : > { %2210 = vmatpush1.bf16.msra.mxu0 %v3239_v37 }
 0x199   : > { %2251 = vmatpush1.bf16.msra.mxu1 %v3242_v38  ;;  %2211 = vmatprep.subr.bf16.mxu0 %v3247_v39 }
 0x19a   : > { %2252 = vmatprep.subr.bf16.mxu1 %v3250_v40 }
 0x19c   : > { %2212 = vmatpush1.bf16.msra.mxu0 %v3245_v41 }
 0x19d   : > { %2253 = vmatpush1.bf16.msra.mxu1 %v3248_v42  ;;  %2213 = vmatprep.subr.bf16.mxu0 %v3253_v43 }
 0x19e   : > { %2254 = vmatprep.subr.bf16.mxu1 %v3256_v44 }
 0x1a0   : > { %2214 = vmatpush1.bf16.msra.mxu0 %v3251_v45 }
 0x1a1   : > { %2255 = vmatpush1.bf16.msra.mxu1 %v3254_v46  ;;  %2215 = vmatprep.subr.bf16.mxu0 %v3259_v47 }
 0x1a2   : > { %2256 = vmatprep.subr.bf16.mxu1 %v3262_v48 }
 0x1a4   : > { %2216 = vmatpush1.bf16.msra.mxu0 %v3257_v49 }
 0x1a5   : > { %2257 = vmatpush1.bf16.msra.mxu1 %v3260_v50  ;;  %2217 = vmatprep.subr.bf16.mxu0 %v3265_v51 }
 0x1a6   : > { %2258 = vmatprep.subr.bf16.mxu1 %v3268_v52 }
 0x1a8   : > { %2218 = vmatpush1.bf16.msra.mxu0 %v3263_v53 }
 0x1a9   : > { %2259 = vmatpush1.bf16.msra.mxu1 %v3266_v54  ;;  %2219 = vmatprep.subr.bf16.mxu0 %v3271_v55 }
 0x1aa   : > { %2260 = vmatprep.subr.bf16.mxu1 %v3274_v56 }
 0x1ac   : > { %2220 = vmatpush1.bf16.msra.mxu0 %v3269_v57 }
 0x1ad   : > { %2261 = vmatpush1.bf16.msra.mxu1 %v3272_v58  ;;  %2221 = vmatprep.subr.bf16.mxu0 %v3277_v59 }
 0x1ae   : > { %2262 = vmatprep.subr.bf16.mxu1 %v3280_v60 }
 0x1b0   : > { %2222 = vmatpush1.bf16.msra.mxu0 %v3275_v61 }
 0x1b1   : > { %2263 = vmatpush1.bf16.msra.mxu1 %v3278_v62  ;;  %2223 = vmatprep.subr.bf16.mxu0 %v3283_v63 }
 0x1b2   : > { %2264 = vmatprep.subr.bf16.mxu1 %v3286_v0  ;;  %v355_v0 = vld [vmem:[#allocation2] sm:$0xff] }
 0x1b4   : > { %2224 = vmatpush1.bf16.msra.mxu0 %v3281_v1 }
 0x1b5   : > { %2265 = vmatpush1.bf16.msra.mxu1 %v3284_v2  ;;  %2225 = vmatprep.subr.bf16.mxu0 %v3289_v3 }
 0x1b6   : > { %2266 = vmatprep.subr.bf16.mxu1 %v3292_v4 }
 0x1b8   : > { %2226 = vmatpush1.bf16.msra.mxu0 %v3287_v5  ;;  %v356_v5 = vld [vmem:[#allocation2 + $0x8] sm:$0xff] }
 0x1b9   : > { %2267 = vmatpush1.bf16.msra.mxu1 %v3290_v6  ;;  %2227 = vmatprep.subr.bf16.mxu0 %v3295_v7 }
 0x1ba   : > { %2268 = vmatprep.subr.bf16.mxu1 %v3298_v8 }
 0x1bc   : > { %2228 = vmatpush1.bf16.msra.mxu0 %v3293_v9 }
 0x1bd   : > { %2269 = vmatpush1.bf16.msra.mxu1 %v3296_v10  ;;  %2229 = vmatprep.subr.bf16.mxu0 %v3301_v11  ;;  %v2297_v11 = vlaneseq (!%p2776_p0) }
 0x1be   : > { %2270 = vmatprep.subr.bf16.mxu1 %v3304_v12 }
 0x1bf   : > { %v2298_v12 = vshrl.u32 (!%p2776_p0), %v2297_v11, 7 }
 0x1c0   : > { %2230 = vmatpush1.bf16.msra.mxu0 %v3299_v13  ;;  %v2295_v13 = vld [vmem:[%s292_s25] sm:$0x3] (!%p2776_p0) }
 0x1c1   : > { %2271 = vmatpush1.bf16.msra.mxu1 %v3302_v14  ;;  %2231 = vmatprep.subr.bf16.mxu0 %v3307_v15  ;;  %v2299_v14 = vsub.s32 (!%p2776_p0), 0, %v2298_v12  ;;  %v2303_v15 = vsub.s32 (!%p2776_p0), 1, %v2298_v12 }
 0x1c2   : > { %2272 = vmatprep.subr.bf16.mxu1 %v3310_v16 }
 0x1c4   : > { %2232 = vmatpush1.bf16.msra.mxu0 %v3305_v17 }
 0x1c5   : > { %2273 = vmatpush1.bf16.msra.mxu1 %v3308_v18  ;;  %2233 = vmatprep.subr.bf16.mxu0 %v3313_v21  ;;  %v2300_v18 = vrot.slane (!%p2776_p0), %v2295_v13, %v2299_v14  ;;  %v2304_v21 = vrot.slane (!%p2776_p0), %v2295_v13, %v2303_v15 }
 0x1c6   : > { %2274 = vmatprep.subr.bf16.mxu1 %v3316_v22  ;;  %v2315_v22 = vld [vmem:[%s301_s18] sm:$0x3] (!%p2776_p0) }
 0x1c8   : > { %2234 = vmatpush1.bf16.msra.mxu0 %v3311_v25 }
 0x1c9   : > { %2275 = vmatpush1.bf16.msra.mxu1 %v3314_v26 }
 0x1cb   : > { %2236 = vmatmul.mubr.bf16.vlgmr.msra.gmra.mrb[12].mxu0 %v2516_v27  ;;  %v2320_v27 = vrot.slane (!%p2776_p0), %v2315_v22, %v2299_v14 }
 0x1cc   : > { %2277 = vmatmul.mubr.bf16.vlgmr.msra.gmra.mrb[12].mxu1 %v2518_v28  ;;  %v2324_v28 = vrot.slane (!%p2776_p0), %v2315_v22, %v2303_v15 }
 0x1de   : > { %v1991_v19 = vpop.f32.mrb[0].mxu0 }
 0x1df   : > { %v2032_v20 = vpop.f32.mrb[0].mxu1  ;;  %v1993_v30 = vpop.f32.mrb[1].mxu0 }
 0x1e0   : > { %v2033_v29 = vadd.f32 %v2032_v20, %v1991_v19  ;;  %v2034_v31 = vpop.f32.mrb[1].mxu1  ;;  %v1995_v33 = vpop.f32.mrb[2].mxu0 }
 0x1e1   : > { %v2035_v32 = vadd.f32 %v2034_v31, %v1993_v30  ;;  %v2036_v34 = vpop.f32.mrb[2].mxu1  ;;  %v1996_v35 = vpop.f32.mrb[3].mxu0 }
 0x1e2   : > { %v2037_v36 = vpop.f32.mrb[3].mxu1 }
 0x21e   : > { %v2073_v37 = vpop.f32.mrb[4].mxu0 }
 0x21f   : > { %v2114_v38 = vpop.f32.mrb[4].mxu1  ;;  %v2074_v23 = vadd.f32 %v2073_v37, %v2033_v29  ;;  %v2075_v39 = vpop.f32.mrb[5].mxu0 }
 0x220   : > { %v2116_v40 = vpop.f32.mrb[5].mxu1  ;;  %v2076_v24 = vadd.f32 %v2075_v39, %v2035_v32  ;;  %v2077_v41 = vpop.f32.mrb[6].mxu0 }
 0x221   : > { %v2118_v42 = vpop.f32.mrb[6].mxu1  ;;  %v2115_v43 = vadd.f32 %v2114_v38, %v2074_v23  ;;  %v2078_v44 = vpop.f32.mrb[7].mxu0 }
 0x222   : > { %v2119_v45 = vpop.f32.mrb[7].mxu1  ;;  %v2117_v46 = vadd.f32 %v2116_v40, %v2076_v24 }
 0x25e   : > { %v2155_v47 = vpop.f32.mrb[8].mxu0 }
 0x25f   : > { %v2196_v48 = vpop.f32.mrb[8].mxu1  ;;  %v2156_v49 = vadd.f32 %v2155_v47, %v2115_v43  ;;  %v2157_v50 = vpop.f32.mrb[9].mxu0 }
 0x260   : > { %v2198_v51 = vpop.f32.mrb[9].mxu1  ;;  %v2158_v52 = vadd.f32 %v2157_v50, %v2117_v46  ;;  %v2159_v53 = vpop.f32.mrb[10].mxu0 }
 0x261   : > { %v2200_v54 = vpop.f32.mrb[10].mxu1  ;;  %v2197_v55 = vadd.f32 %v2196_v48, %v2156_v49  ;;  %v2160_v56 = vpop.f32.mrb[11].mxu0 }
 0x262   : > { %v2201_v57 = vpop.f32.mrb[11].mxu1  ;;  %v2199_v58 = vadd.f32 %v2198_v51, %v2158_v52 }
 0x29e   : > { %v2237_v59 = vpop.f32.mrb[12].mxu0 }
 0x29f   : > { %v2278_v60 = vpop.f32.mrb[12].mxu1  ;;  %v2238_v61 = vadd.f32 %v2237_v59, %v2197_v55  ;;  %v2239_v62 = vpop.f32.mrb[13].mxu0 }
 0x2a0   : > { %v2280_v63 = vpop.f32.mrb[13].mxu1  ;;  %v2240_v1 = vadd.f32 %v2239_v62, %v2199_v58  ;;  %v2241_v2 = vpop.f32.mrb[14].mxu0  ;;  %2292 = sbr.rel (%p2776_p0) target bundleno = 838 (0x346), region = 60 }
 0x2a1   : > { %v2282_v3 = vpop.f32.mrb[14].mxu1  ;;  %v2279_v4 = vadd.f32 %v2278_v60, %v2238_v61  ;;  %v2242_v6 = vpop.f32.mrb[15].mxu0 }
 0x2a2   : > { %v2283_v7 = vpop.f32.mrb[15].mxu1  ;;  %v2281_v8 = vadd.f32 %v2280_v63, %v2240_v1 }
 0x2a3   : > { %v2285_v9 = vadd.f32 %v2279_v4, %v355_v0 }
 0x2a4   : > { %v2286_v10 = vadd.f32 %v2281_v8, %v356_v5 }
 0x2a5   : > { %2287 = vst [vmem:[#allocation2] sm:$0xff] %v2285_v9 }
 0x2a6   : > { %2288 = vst [vmem:[#allocation2 + $0x8] sm:$0xff] %v2286_v10 }
 0x2ac   : > { %v2293_v16 = vld [vmem:[#allocation2] sm:$0xff] }
 0x2ad   : > { %v2294_v17 = vld [vmem:[#allocation2 + $0x8] sm:$0xff]  ;;  %v2307_v25 = vadd.f32 %v2300_v18, %v2293_v16 }
 0x2ae   : > { %v2308_v26 = vadd.f32 %v2304_v21, %v2294_v17 }
 0x2af   : > { %vm2309_vm0 = vcmp.ge.f32.partialorder %v2307_v25, 0.0  ;;  %v2311_v19 = vmul.f32 0.01, %v2307_v25 }
 0x2b0   : > { %vm2310_vm1 = vcmp.ge.f32.partialorder %v2308_v26, 0.0  ;;  %v2312_v20 = vmul.f32 0.01, %v2308_v26 }
 0x2b1   : > { %v2313_v29 = vsel %vm2309_vm0, %v2307_v25, %v2311_v19 }
 0x2b2   : > { %v2314_v30 = vsel %vm2310_vm1, %v2308_v26, %v2312_v20  ;;  %v2327_v31 = vmul.f32 %v2320_v27, %v2313_v29 }
 0x2b3   : > { %v2328_v32 = vmul.f32 %v2324_v28, %v2314_v30 }
 0x2b5   : > { %v2329_v33 = vadd.f32 %v2328_v32, %v2327_v31 }
 0x2b7   : > { %2330 = vadd.xlane.f32.xlu0 %v2329_v33 }
 0x344   : > { %v2331_v34 = vpop.xlane.xlu0 %2330 }
 0x345   : > { %2333 = vst.msk [vmem:[%s3958_s1] sm:$0xff] %vm2332_vm2, %v2331_v34 }
 0x346 PF: > { %s23_s28 = sadd.s32 1, %s3567_s28   ;;  %s4374_s14 = sld [smem:[#allocation17_spill]] }
 0x347   : > { %p4268_p12 = scmp.ge.s32.totalorder %s23_s28, 6   ;;  %s4375_s7 = sld [smem:[#allocation18_spill]] }
 0x348   : > { %s4376_s15 = smov %s3519_s16  ;;  %s4377_s16 = smov %s3523_s17 }
 0x349   : > { %s4378_s17 = smov %s3839_s8  ;;  %s4379_s18 = smov %s3531_s19 }
 0x34a   : > { %s4380_s19 = smov %s3535_s20  ;;  %s4381_s20 = smov %s3707_s29 }
 0x34b   : > { %s4382_s21 = smov %s3543_s22  ;;  %s4383_s22 = smov %s3547_s23 }
 0x34c   : > { %s4384_s23 = smov %s3768_s9  ;;  %s4385_s24 = smov %s3559_s26 }
 0x34d   : > { %s4386_s25 = smov %s3563_s27  ;;  %s4387_s26 = smov %s4374_s14 }
 0x34e   : > { %s4388_s27 = smov %s4375_s7  ;;  %22 = sbr.rel (!%p4268_p12) target bundleno = 18 (0x12), region = 121 }
 0x355   :  { %2353 = vsyncpa [#allocation4], 1 }
 0x356   :  { %2355 = vsyncpa [#allocation4 + $0x1], 1 }
 0x357   :  { %2356 = vsyncpa [#allocation6], 1 }
 0x358   :  { %2358 = vsyncpa [#allocation6 + $0x1], 1 }
 0x359   :  { %2359 = vsyncpa [#allocation9], 1 }
 0x35a   :  { %2361 = vsyncpa [#allocation9 + $0x1], 1 }

</bundles_post_ra>
